<compile_context>
chip_gen: v6e
topology: v6e:2x2x1
jax: 0.10.0
libtpu: 0.0.40
codegen_flags: <defaults>
</compile_context>

<pallas_src>
import jax
import jax.numpy as jnp
from jax import lax
from jax.experimental import pallas as pl
from jax.experimental.pallas import tpu as pltpu

KSIZE = 7
PAD = (KSIZE - 1) // 2


def _adib_kernel(sc_ref, mcat_ref, x_ref, o1_ref, o2_ref, pad_ref, stack_ref):
    """Both AttentionGates for a block of BT batch elements, NCHW in / NCHW out.

    sc_ref    : (2, 4) SMEM   -- per branch [sigmoid(w0), sigmoid(w1), bn_scale, bn_shift]
    mcat_ref  : (2, C, 7C) VMEM -- collapsed conv matrices (weights folded with row shifts)
    x_ref     : (BT, C, H, W) VMEM input block
    o1_ref    : (BT, C, H, W) VMEM output block (x_out11)
    o2_ref    : (BT, C, H, W) VMEM output block (x_out21)
    pad_ref   : (C, max(H,W)+2*PAD) f32 scratch -- zero-padded pooled plane
    stack_ref : (7C, max(H,W))      f32 scratch -- stacked column-shifted pooled planes
    """
    BT, C, H, W = x_ref.shape
    out_dtype = o1_ref.dtype

    def conv7x7(pooled, mcat, q):
        # Zero-padded 7x7 cross-correlation on the (C, q) pooled plane as ONE MXU
        # matmul:  conv = Mcat @ ColsStack, with ColsStack[j*C:(j+1)*C, :] = pooled
        # shifted by (j - PAD) columns (zero fill).  Lane shifts are cheap ref windows
        # of the padded scratch; no O(q^2) constants are fetched from HBM.
        pad_ref[...] = jnp.zeros(pad_ref.shape, jnp.float32)
        pad_ref[:, pl.ds(PAD, q)] = pooled
        for j in range(KSIZE):
            stack_ref[pl.ds(j * C, C), pl.ds(0, q)] = pad_ref[:, pl.ds(j, q)]
        return jnp.dot(mcat, stack_ref[pl.ds(0, KSIZE * C), pl.ds(0, q)],
                       preferred_element_type=jnp.float32)

    def gate(mean, std, mcat, branch, q):
        w0 = sc_ref[branch, 0]
        w1 = sc_ref[branch, 1]
        bn_scale = sc_ref[branch, 2]
        bn_shift = sc_ref[branch, 3]
        pooled = 0.5 * (std + mean) + w0 * std + w1 * mean
        # TODO(synk): BatchNorm2d applied in eval mode (running stats folded to an
        # affine scale/shift); train-mode batch statistics are not modeled.
        conv = conv7x7(pooled, mcat, q) * bn_scale + bn_shift
        return jax.nn.sigmoid(conv)

    # Guard N == 1 (PyTorch's ddof=1 std would give NaN there).
    inv_h = 1.0 / float(max(H - 1, 1))
    inv_w = 1.0 / float(max(W - 1, 1))

    mc_cw = mcat_ref[0]                                    # (C, 7C)
    mc_hc = mcat_ref[1]

    for b in range(BT):
        x_nat = x_ref[b]                                   # (C, H, W), input dtype
        # One shared squared slab (the only full-slab f32 temporary); reductions
        # accumulate in f32, x itself is never upcast for the multiplies/stores.
        xsq = jnp.square(x_nat.astype(jnp.float32))        # (C, H, W) f32

        # ---- branch 1 ("cw"): reduce over H, gate per (C, W), broadcast over H ----
        s1 = jnp.sum(x_nat, axis=1, dtype=jnp.float32)     # (C, W)
        q1 = jnp.sum(xsq, axis=1)                          # (C, W)
        mean1 = s1 * (1.0 / H)
        var1 = jnp.maximum(q1 - H * mean1 * mean1, 0.0) * inv_h   # unbiased (ddof=1)
        g1 = gate(mean1, jnp.sqrt(var1), mc_cw, 0, W)      # (C, W)
        o1_ref[b] = (x_nat * g1.astype(out_dtype)[:, None, :]).astype(out_dtype)

        # ---- branch 2 ("hc"): reduce over W, gate per (C, H), broadcast over W ----
        # TODO(synk): route this lane-axis reduction through the MXU (dot with a ones
        # vector) once the (C,H)-shaped result relayout is expressible without an
        # unsupported in-register reshape; kept as a vector reduce for robustness.
        s2 = jnp.sum(x_nat, axis=2, dtype=jnp.float32)     # (C, H)
        q2 = jnp.sum(xsq, axis=2)                          # (C, H)
        mean2 = s2 * (1.0 / W)
        var2 = jnp.maximum(q2 - W * mean2 * mean2, 0.0) * inv_w
        g2 = gate(mean2, jnp.sqrt(var2), mc_hc, 1, H)      # (C, H)
        o2_ref[b] = (x_nat * g2.astype(out_dtype)[:, :, None]).astype(out_dtype)


def _collapsed_conv_matrix(k_eff, c):
    """(C, 7C) with columns [j*C:(j+1)*C] = sum_i k_eff[i, j] * ShiftC[i].

    ShiftC[i][p, p'] = 1 if p' == p + i - PAD else 0 (zero-padded row shift), so the
    single matmul  Mcat @ ColsStack  realizes the full zero-padded 7x7 cross-correlation
    over the (C, Q) plane.
    """
    p = jnp.arange(c)[:, None]
    pp = jnp.arange(c)[None, :]
    di = pp - p + PAD                                      # row-tap index i, (c, c)
    valid = (di >= 0) & (di < KSIZE)
    dic = jnp.clip(di, 0, KSIZE - 1)
    taps = jnp.transpose(k_eff)[:, dic]                    # (7_j, c, c): k_eff[dic, j]
    m = jnp.where(valid[None, :, :], taps, 0.0)            # (7, c, c)
    return jnp.concatenate([m[j] for j in range(KSIZE)], axis=1).astype(jnp.float32)


def adib_block_forward(x, cw_params, hc_params):
    """x: (B, C, H, W) NCHW -> (x_out11, x_out21), both (B, C, H, W)."""
    B, C, H, W = x.shape
    cw_w, cw_sc = cw_params
    hc_w, hc_sc = hc_params

    scalars = jnp.stack([cw_sc, hc_sc]).astype(jnp.float32)          # (2, 4)
    # Branch 1's conv runs over the (C, W) plane with the cw weight; branch 2's conv
    # runs over PyTorch's (H, C) plane, which in our (C, H) orientation is the
    # transposed hc weight.
    mcat = jnp.stack([
        _collapsed_conv_matrix(cw_w.astype(jnp.float32), C),
        _collapsed_conv_matrix(hc_w.T.astype(jnp.float32), C),
    ])                                                               # (2, C, 7C)

    itemsize = jnp.dtype(x.dtype).itemsize
    slab_bytes = C * H * W * itemsize

    # Pack several batch elements per grid step for small feature maps (amortizes the
    # ~0.35us/step overhead), but keep >= 2 grid steps whenever B >= 2 so both v7x
    # TensorCores get parallel work.
    bt = max(1, min(B, (2 << 20) // max(slab_bytes, 1)))
    bt = min(bt, 8)                                        # bound kernel unrolling
    if B >= 2:
        bt = min(bt, max(1, B // 2))
    while B % bt:
        bt -= 1
    grid = (B // bt,)

    # Generation-aware VMEM budget: double-buffered in/out blocks + one shared f32
    # squared slab per sample + the tiny collapsed-conv constants and scratch + slack.
    try:
        info = pltpu.get_tpu_info()
        vmem_cap = int(getattr(info, "vmem_capacity_bytes", 128 * 2**20))
    except Exception:                                      # not on a TPU host
        vmem_cap = 128 * 2**20
    hard_cap = min(100 * 2**20, vmem_cap - 8 * 2**20)      # ~56 MiB on v7x, 100 MiB on v5e/v6e
    f32_slab = C * H * W * 4
    qmax = max(H, W)
    aux_bytes = 2 * 2 * C * (KSIZE * C) * 4 + (KSIZE + 1) * C * (qmax + 2 * PAD) * 4
    vmem_needed = 2 * 3 * bt * slab_bytes + 2 * bt * f32_slab + aux_bytes + (2 << 20)
    vmem_limit = int(min(hard_cap, max(32 * 2**20, vmem_needed)))

    cost = pl.CostEstimate(
        flops=int(B * (2 * 2 * C * (KSIZE * C) * (H + W) + 12 * C * H * W)),
        transcendentals=int(B * C * (H + W)),
        bytes_accessed=int(3 * B * C * H * W * itemsize),   # read x once, write 2 outputs
    )

    out_shape = (jax.ShapeDtypeStruct((B, C, H, W), x.dtype),
                 jax.ShapeDtypeStruct((B, C, H, W), x.dtype))

    # TODO(synk): when W < 128, present a lane-dense (C, H*W)-folded output slab to
    # avoid masked partial stores; kept in natural NCHW layout here.
    return pl.pallas_call(
        _adib_kernel,
        out_shape=out_shape,
        grid=grid,
        in_specs=[
            pl.BlockSpec(memory_space=pltpu.MemorySpace.SMEM),           # (2, 4) scalars
            pl.BlockSpec((2, C, KSIZE * C), lambda i: (0, 0, 0)),        # collapsed conv mats
            pl.BlockSpec((bt, C, H, W), lambda i: (i, 0, 0, 0)),         # x
        ],
        out_specs=[
            pl.BlockSpec((bt, C, H, W), lambda i: (i, 0, 0, 0)),         # x_out11
            pl.BlockSpec((bt, C, H, W), lambda i: (i, 0, 0, 0)),         # x_out21
        ],
        scratch_shapes=[
            pltpu.VMEM((C, qmax + 2 * PAD), jnp.float32),                # padded pooled plane
            pltpu.VMEM((KSIZE * C, qmax), jnp.float32),                  # stacked shifted planes
        ],
        compiler_params=pltpu.CompilerParams(
            dimension_semantics=("parallel",),
            vmem_limit_bytes=vmem_limit,
        ),
        cost_estimate=cost,
    )(scalars, mcat, x)


def init_gate_params(key):
    """Deterministic parameters for one AttentionGate (conv + ADPool + BN, eval-mode)."""
    k1, k2, k3, k4 = jax.random.split(key, 4)
    # Conv2d(1, 1, 7, 7, bias=False) weight (kaiming-uniform-ish scale)
    conv_w = (jax.random.uniform(k1, (KSIZE, KSIZE), jnp.float32) - 0.5) * (2.0 / KSIZE)
    # ADPool weight: torch.rand(2)
    adp_w = jax.random.uniform(k2, (2,), jnp.float32)
    w_sig = jax.nn.sigmoid(adp_w)
    # BatchNorm2d(1): affine params (randomized, deterministic), fresh running stats
    gamma = 1.0 + 0.1 * jax.random.normal(k3, (), jnp.float32)
    beta = 0.1 * jax.random.normal(k4, (), jnp.float32)
    running_mean = jnp.float32(0.0)
    running_var = jnp.float32(1.0)
    eps = 1e-5
    bn_scale = gamma / jnp.sqrt(running_var + eps)
    bn_shift = beta - running_mean * bn_scale
    scalars = jnp.stack([w_sig[0], w_sig[1], bn_scale, bn_shift]).astype(jnp.float32)
    return conv_w, scalars


# ---------------- pure-JAX reference (for validation) ----------------
def _attention_gate_ref(t, conv_w, scalars):
    w0, w1, bn_scale, bn_shift = scalars[0], scalars[1], scalars[2], scalars[3]
    mean = jnp.mean(t, axis=1, keepdims=True)
    std = jnp.std(t, axis=1, keepdims=True, ddof=1)
    pooled = 0.5 * (std + mean) + w0 * std + w1 * mean
    conv = lax.conv_general_dilated(
        pooled, conv_w.reshape(1, 1, KSIZE, KSIZE),
        window_strides=(1, 1), padding=((PAD, PAD), (PAD, PAD)),
        dimension_numbers=("NCHW", "OIHW", "NCHW"))
    conv = conv * bn_scale + bn_shift
    return t * jax.nn.sigmoid(conv)


def _adib_block_ref(x, cw_params, hc_params):
    x_perm1 = jnp.transpose(x, (0, 2, 1, 3))
    x_out11 = jnp.transpose(_attention_gate_ref(x_perm1, *cw_params), (0, 2, 1, 3))
    x_perm2 = jnp.transpose(x, (0, 3, 2, 1))
    x_out21 = jnp.transpose(_attention_gate_ref(x_perm2, *hc_params), (0, 3, 2, 1))
    return x_out11, x_out21


if __name__ == "__main__":
    key = jax.random.PRNGKey(0)
    kx, kcw, khc = jax.random.split(key, 3)

    B, C, H, W = 2, 4, 16, 16
    x = jax.random.normal(kx, (B, C, H, W), jnp.float32)
    cw_params = init_gate_params(kcw)   # AttentionGate "cw"
    hc_params = init_gate_params(khc)   # AttentionGate "hc"

    out11, out21 = jax.jit(adib_block_forward)(x, cw_params, hc_params)
    jax.block_until_ready((out11, out21))

    ref11, ref21 = _adib_block_ref(x, cw_params, hc_params)
    assert out11.shape == (B, C, H, W) and out21.shape == (B, C, H, W)
    assert jnp.allclose(out11, ref11, atol=1e-4, rtol=1e-4)
    assert jnp.allclose(out21, ref21, atol=1e-4, rtol=1e-4)

    print("KERNEL_OK")
</pallas_src>

<mosaic_0001>
module attributes {stable_mosaic.version = 11 : i64} {
  func.func @_adib_kernel(%arg0: i32, %arg1: memref<2x4xf32, #tpu.memory_space<smem>>, %arg2: memref<2x4x28xf32, #tpu.memory_space<vmem>>, %arg3: memref<1x4x16x16xf32, #tpu.memory_space<vmem>>, %arg4: memref<1x4x16x16xf32, #tpu.memory_space<vmem>>, %arg5: memref<1x4x16x16xf32, #tpu.memory_space<vmem>>, %arg6: memref<4x22xf32, #tpu.memory_space<vmem>>, %arg7: memref<28x16xf32, #tpu.memory_space<vmem>>) attributes {dimension_semantics = [#tpu.dimension_semantics<parallel>], iteration_bounds = array<i64: 2>, scalar_prefetch = 0 : i64, scratch_operands = 2 : i64, tpu.core_type = #tpu.core_type<tc>, window_params = [{transform_indices = @transform_0, window_bounds = array<i64: 2, 4>}, {pipeline_mode = #tpu.pipeline_mode<synchronous>, transform_indices = @transform_1, window_bounds = array<i64: 2, 4, 28>}, {transform_indices = @transform_2, window_bounds = array<i64: 1, 4, 16, 16>}, {transform_indices = @transform_3, window_bounds = array<i64: 1, 4, 16, 16>}, {transform_indices = @transform_4, window_bounds = array<i64: 1, 4, 16, 16>}]} {
    %c0 = arith.constant 0 : index
    %c0_0 = arith.constant 0 : index
    %c0_1 = arith.constant 0 : index
    %0 = vector.load %arg2[%c0, %c0_0, %c0_1] : memref<2x4x28xf32, #tpu.memory_space<vmem>>, vector<1x4x28xf32>
    %1 = vector.shape_cast %0 : vector<1x4x28xf32> to vector<4x28xf32>
    %c1 = arith.constant 1 : index
    %c0_2 = arith.constant 0 : index
    %c0_3 = arith.constant 0 : index
    %2 = vector.load %arg2[%c1, %c0_2, %c0_3] : memref<2x4x28xf32, #tpu.memory_space<vmem>>, vector<1x4x28xf32>
    %3 = vector.shape_cast %2 : vector<1x4x28xf32> to vector<4x28xf32>
    %c0_4 = arith.constant 0 : index
    %c0_5 = arith.constant 0 : index
    %c0_6 = arith.constant 0 : index
    %c0_7 = arith.constant 0 : index
    %4 = vector.load %arg3[%c0_4, %c0_5, %c0_6, %c0_7] : memref<1x4x16x16xf32, #tpu.memory_space<vmem>>, vector<1x4x16x16xf32>
    %5 = vector.shape_cast %4 : vector<1x4x16x16xf32> to vector<4x16x16xf32>
    %6 = arith.mulf %5, %5 : vector<4x16x16xf32>
    %cst = arith.constant dense<0.000000e+00> : vector<4x16xf32>
    %7 = vector.multi_reduction <add>, %5, %cst [1] : vector<4x16x16xf32> to vector<4x16xf32>
    %cst_8 = arith.constant dense<0.000000e+00> : vector<4x16xf32>
    %8 = vector.multi_reduction <add>, %6, %cst_8 [1] : vector<4x16x16xf32> to vector<4x16xf32>
    %cst_9 = arith.constant 6.250000e-02 : f32
    %9 = vector.broadcast %cst_9 : f32 to vector<4x16xf32>
    %10 = arith.mulf %7, %9 : vector<4x16xf32>
    %cst_10 = arith.constant 1.600000e+01 : f32
    %11 = vector.broadcast %cst_10 : f32 to vector<4x16xf32>
    %12 = arith.mulf %11, %10 : vector<4x16xf32>
    %13 = arith.mulf %12, %10 : vector<4x16xf32>
    %14 = arith.subf %8, %13 : vector<4x16xf32>
    %cst_11 = arith.constant 0.000000e+00 : f32
    %15 = vector.broadcast %cst_11 : f32 to vector<4x16xf32>
    %16 = arith.maximumf %14, %15 : vector<4x16xf32>
    %cst_12 = arith.constant 0.0666666701 : f32
    %17 = vector.broadcast %cst_12 : f32 to vector<4x16xf32>
    %18 = arith.mulf %16, %17 : vector<4x16xf32>
    %19 = math.sqrt %18 : vector<4x16xf32>
    %c0_13 = arith.constant 0 : index
    %c0_14 = arith.constant 0 : index
    %20 = memref.load %arg1[%c0_13, %c0_14] : memref<2x4xf32, #tpu.memory_space<smem>>
    %c0_15 = arith.constant 0 : index
    %c1_16 = arith.constant 1 : index
    %21 = memref.load %arg1[%c0_15, %c1_16] : memref<2x4xf32, #tpu.memory_space<smem>>
    %c0_17 = arith.constant 0 : index
    %c2 = arith.constant 2 : index
    %22 = memref.load %arg1[%c0_17, %c2] : memref<2x4xf32, #tpu.memory_space<smem>>
    %c0_18 = arith.constant 0 : index
    %c3 = arith.constant 3 : index
    %23 = memref.load %arg1[%c0_18, %c3] : memref<2x4xf32, #tpu.memory_space<smem>>
    %24 = arith.addf %19, %10 : vector<4x16xf32>
    %cst_19 = arith.constant 5.000000e-01 : f32
    %25 = vector.broadcast %cst_19 : f32 to vector<4x16xf32>
    %26 = arith.mulf %25, %24 : vector<4x16xf32>
    %27 = vector.broadcast %20 : f32 to vector<4x16xf32>
    %28 = arith.mulf %27, %19 : vector<4x16xf32>
    %29 = arith.addf %26, %28 : vector<4x16xf32>
    %30 = vector.broadcast %21 : f32 to vector<4x16xf32>
    %31 = arith.mulf %30, %10 : vector<4x16xf32>
    %32 = arith.addf %29, %31 : vector<4x16xf32>
    %cst_20 = arith.constant 0.000000e+00 : f32
    %33 = vector.broadcast %cst_20 : f32 to vector<4x22xf32>
    %c0_21 = arith.constant 0 : index
    %c0_22 = arith.constant 0 : index
    %34 = vector.load %arg6[%c0_21, %c0_22] : memref<4x22xf32, #tpu.memory_space<vmem>>, vector<4x22xf32>
    tpu.vector_store %arg6[%c0_21, %c0_22], %33 {strides = array<i32>} : memref<4x22xf32, #tpu.memory_space<vmem>>, vector<4x22xf32>,
    %c0_23 = arith.constant 0 : index
    %c3_24 = arith.constant 3 : index
    %35 = vector.load %arg6[%c0_23, %c3_24] : memref<4x22xf32, #tpu.memory_space<vmem>>, vector<4x16xf32>
    tpu.vector_store %arg6[%c0_23, %c3_24], %32 {strides = array<i32>} : memref<4x22xf32, #tpu.memory_space<vmem>>, vector<4x16xf32>,
    %c0_25 = arith.constant 0 : index
    %c0_26 = arith.constant 0 : index
    %36 = vector.load %arg6[%c0_25, %c0_26] : memref<4x22xf32, #tpu.memory_space<vmem>>, vector<4x16xf32>
    %c0_27 = arith.constant 0 : index
    %c0_28 = arith.constant 0 : index
    %37 = vector.load %arg7[%c0_27, %c0_28] : memref<28x16xf32, #tpu.memory_space<vmem>>, vector<4x16xf32>
    tpu.vector_store %arg7[%c0_27, %c0_28], %36 {strides = array<i32>} : memref<28x16xf32, #tpu.memory_space<vmem>>, vector<4x16xf32>,
    %c0_29 = arith.constant 0 : index
    %c1_30 = arith.constant 1 : index
    %38 = vector.load %arg6[%c0_29, %c1_30] : memref<4x22xf32, #tpu.memory_space<vmem>>, vector<4x16xf32>
    %c4 = arith.constant 4 : index
    %c0_31 = arith.constant 0 : index
    %39 = vector.load %arg7[%c4, %c0_31] : memref<28x16xf32, #tpu.memory_space<vmem>>, vector<4x16xf32>
    tpu.vector_store %arg7[%c4, %c0_31], %38 {strides = array<i32>} : memref<28x16xf32, #tpu.memory_space<vmem>>, vector<4x16xf32>,
    %c0_32 = arith.constant 0 : index
    %c2_33 = arith.constant 2 : index
    %40 = vector.load %arg6[%c0_32, %c2_33] : memref<4x22xf32, #tpu.memory_space<vmem>>, vector<4x16xf32>
    %c8 = arith.constant 8 : index
    %c0_34 = arith.constant 0 : index
    %41 = vector.load %arg7[%c8, %c0_34] : memref<28x16xf32, #tpu.memory_space<vmem>>, vector<4x16xf32>
    tpu.vector_store %arg7[%c8, %c0_34], %40 {strides = array<i32>} : memref<28x16xf32, #tpu.memory_space<vmem>>, vector<4x16xf32>,
    %c0_35 = arith.constant 0 : index
    %c3_36 = arith.constant 3 : index
    %42 = vector.load %arg6[%c0_35, %c3_36] : memref<4x22xf32, #tpu.memory_space<vmem>>, vector<4x16xf32>
    %c12 = arith.constant 12 : index
    %c0_37 = arith.constant 0 : index
    %43 = vector.load %arg7[%c12, %c0_37] : memref<28x16xf32, #tpu.memory_space<vmem>>, vector<4x16xf32>
    tpu.vector_store %arg7[%c12, %c0_37], %42 {strides = array<i32>} : memref<28x16xf32, #tpu.memory_space<vmem>>, vector<4x16xf32>,
    %c0_38 = arith.constant 0 : index
    %c4_39 = arith.constant 4 : index
    %44 = vector.load %arg6[%c0_38, %c4_39] : memref<4x22xf32, #tpu.memory_space<vmem>>, vector<4x16xf32>
    %c16 = arith.constant 16 : index
    %c0_40 = arith.constant 0 : index
    %45 = vector.load %arg7[%c16, %c0_40] : memref<28x16xf32, #tpu.memory_space<vmem>>, vector<4x16xf32>
    tpu.vector_store %arg7[%c16, %c0_40], %44 {strides = array<i32>} : memref<28x16xf32, #tpu.memory_space<vmem>>, vector<4x16xf32>,
    %c0_41 = arith.constant 0 : index
    %c5 = arith.constant 5 : index
    %46 = vector.load %arg6[%c0_41, %c5] : memref<4x22xf32, #tpu.memory_space<vmem>>, vector<4x16xf32>
    %c20 = arith.constant 20 : index
    %c0_42 = arith.constant 0 : index
    %47 = vector.load %arg7[%c20, %c0_42] : memref<28x16xf32, #tpu.memory_space<vmem>>, vector<4x16xf32>
    tpu.vector_store %arg7[%c20, %c0_42], %46 {strides = array<i32>} : memref<28x16xf32, #tpu.memory_space<vmem>>, vector<4x16xf32>,
    %c0_43 = arith.constant 0 : index
    %c6 = arith.constant 6 : index
    %48 = vector.load %arg6[%c0_43, %c6] : memref<4x22xf32, #tpu.memory_space<vmem>>, vector<4x16xf32>
    %c24 = arith.constant 24 : index
    %c0_44 = arith.constant 0 : index
    %49 = vector.load %arg7[%c24, %c0_44] : memref<28x16xf32, #tpu.memory_space<vmem>>, vector<4x16xf32>
    tpu.vector_store %arg7[%c24, %c0_44], %48 {strides = array<i32>} : memref<28x16xf32, #tpu.memory_space<vmem>>, vector<4x16xf32>,
    %c0_45 = arith.constant 0 : index
    %c0_46 = arith.constant 0 : index
    %50 = vector.load %arg7[%c0_45, %c0_46] : memref<28x16xf32, #tpu.memory_space<vmem>>, vector<28x16xf32>
    %cst_47 = arith.constant dense<0.000000e+00> : vector<4x16xf32>
    %51 = tpu.matmul %1, %50, %cst_47 {dimension_numbers = #tpu.dot_dimension_numbers<[1], [0], [0], [1], [0, 0, 1, 1], [], []>} : vector<4x28xf32>, vector<28x16xf32>, vector<4x16xf32> -> vector<4x16xf32>
    %52 = vector.broadcast %22 : f32 to vector<4x16xf32>
    %53 = arith.mulf %51, %52 : vector<4x16xf32>
    %54 = vector.broadcast %23 : f32 to vector<4x16xf32>
    %55 = arith.addf %53, %54 : vector<4x16xf32>
    %56 = arith.negf %55 : vector<4x16xf32>
    %57 = math.exp %56 : vector<4x16xf32>
    %cst_48 = arith.constant 1.000000e+00 : f32
    %58 = vector.broadcast %cst_48 : f32 to vector<4x16xf32>
    %59 = arith.addf %58, %57 : vector<4x16xf32>
    %60 = arith.divf %58, %59 : vector<4x16xf32>
    %61 = vector.shape_cast %60 : vector<4x16xf32> to vector<4x1x16xf32>
    %62 = vector.broadcast %61 : vector<4x1x16xf32> to vector<4x16x16xf32>
    %63 = arith.mulf %5, %62 : vector<4x16x16xf32>
    %c0_49 = arith.constant 0 : index
    %c0_50 = arith.constant 0 : index
    %c0_51 = arith.constant 0 : index
    %c0_52 = arith.constant 0 : index
    %64 = vector.load %arg4[%c0_49, %c0_50, %c0_51, %c0_52] : memref<1x4x16x16xf32, #tpu.memory_space<vmem>>, vector<1x4x16x16xf32>
    %65 = vector.shape_cast %64 : vector<1x4x16x16xf32> to vector<4x16x16xf32>
    %66 = vector.shape_cast %63 : vector<4x16x16xf32> to vector<1x4x16x16xf32>
    tpu.vector_store %arg4[%c0_49, %c0_50, %c0_51, %c0_52], %66 {strides = array<i32>} : memref<1x4x16x16xf32, #tpu.memory_space<vmem>>, vector<1x4x16x16xf32>,
    %cst_53 = arith.constant dense<0.000000e+00> : vector<4x16xf32>
    %67 = vector.multi_reduction <add>, %5, %cst_53 [2] : vector<4x16x16xf32> to vector<4x16xf32>
    %cst_54 = arith.constant dense<0.000000e+00> : vector<4x16xf32>
    %68 = vector.multi_reduction <add>, %6, %cst_54 [2] : vector<4x16x16xf32> to vector<4x16xf32>
    %cst_55 = arith.constant 6.250000e-02 : f32
    %69 = vector.broadcast %cst_55 : f32 to vector<4x16xf32>
    %70 = arith.mulf %67, %69 : vector<4x16xf32>
    %cst_56 = arith.constant 1.600000e+01 : f32
    %71 = vector.broadcast %cst_56 : f32 to vector<4x16xf32>
    %72 = arith.mulf %71, %70 : vector<4x16xf32>
    %73 = arith.mulf %72, %70 : vector<4x16xf32>
    %74 = arith.subf %68, %73 : vector<4x16xf32>
    %cst_57 = arith.constant 0.000000e+00 : f32
    %75 = vector.broadcast %cst_57 : f32 to vector<4x16xf32>
    %76 = arith.maximumf %74, %75 : vector<4x16xf32>
    %cst_58 = arith.constant 0.0666666701 : f32
    %77 = vector.broadcast %cst_58 : f32 to vector<4x16xf32>
    %78 = arith.mulf %76, %77 : vector<4x16xf32>
    %79 = math.sqrt %78 : vector<4x16xf32>
    %c1_59 = arith.constant 1 : index
    %c0_60 = arith.constant 0 : index
    %80 = memref.load %arg1[%c1_59, %c0_60] : memref<2x4xf32, #tpu.memory_space<smem>>
    %c1_61 = arith.constant 1 : index
    %c1_62 = arith.constant 1 : index
    %81 = memref.load %arg1[%c1_61, %c1_62] : memref<2x4xf32, #tpu.memory_space<smem>>
    %c1_63 = arith.constant 1 : index
    %c2_64 = arith.constant 2 : index
    %82 = memref.load %arg1[%c1_63, %c2_64] : memref<2x4xf32, #tpu.memory_space<smem>>
    %c1_65 = arith.constant 1 : index
    %c3_66 = arith.constant 3 : index
    %83 = memref.load %arg1[%c1_65, %c3_66] : memref<2x4xf32, #tpu.memory_space<smem>>
    %84 = arith.addf %79, %70 : vector<4x16xf32>
    %cst_67 = arith.constant 5.000000e-01 : f32
    %85 = vector.broadcast %cst_67 : f32 to vector<4x16xf32>
    %86 = arith.mulf %85, %84 : vector<4x16xf32>
    %87 = vector.broadcast %80 : f32 to vector<4x16xf32>
    %88 = arith.mulf %87, %79 : vector<4x16xf32>
    %89 = arith.addf %86, %88 : vector<4x16xf32>
    %90 = vector.broadcast %81 : f32 to vector<4x16xf32>
    %91 = arith.mulf %90, %70 : vector<4x16xf32>
    %92 = arith.addf %89, %91 : vector<4x16xf32>
    %cst_68 = arith.constant 0.000000e+00 : f32
    %93 = vector.broadcast %cst_68 : f32 to vector<4x22xf32>
    %c0_69 = arith.constant 0 : index
    %c0_70 = arith.constant 0 : index
    %94 = vector.load %arg6[%c0_69, %c0_70] : memref<4x22xf32, #tpu.memory_space<vmem>>, vector<4x22xf32>
    tpu.vector_store %arg6[%c0_69, %c0_70], %93 {strides = array<i32>} : memref<4x22xf32, #tpu.memory_space<vmem>>, vector<4x22xf32>,
    %c0_71 = arith.constant 0 : index
    %c3_72 = arith.constant 3 : index
    %95 = vector.load %arg6[%c0_71, %c3_72] : memref<4x22xf32, #tpu.memory_space<vmem>>, vector<4x16xf32>
    tpu.vector_store %arg6[%c0_71, %c3_72], %92 {strides = array<i32>} : memref<4x22xf32, #tpu.memory_space<vmem>>, vector<4x16xf32>,
    %c0_73 = arith.constant 0 : index
    %c0_74 = arith.constant 0 : index
    %96 = vector.load %arg6[%c0_73, %c0_74] : memref<4x22xf32, #tpu.memory_space<vmem>>, vector<4x16xf32>
    %c0_75 = arith.constant 0 : index
    %c0_76 = arith.constant 0 : index
    %97 = vector.load %arg7[%c0_75, %c0_76] : memref<28x16xf32, #tpu.memory_space<vmem>>, vector<4x16xf32>
    tpu.vector_store %arg7[%c0_75, %c0_76], %96 {strides = array<i32>} : memref<28x16xf32, #tpu.memory_space<vmem>>, vector<4x16xf32>,
    %c0_77 = arith.constant 0 : index
    %c1_78 = arith.constant 1 : index
    %98 = vector.load %arg6[%c0_77, %c1_78] : memref<4x22xf32, #tpu.memory_space<vmem>>, vector<4x16xf32>
    %c4_79 = arith.constant 4 : index
    %c0_80 = arith.constant 0 : index
    %99 = vector.load %arg7[%c4_79, %c0_80] : memref<28x16xf32, #tpu.memory_space<vmem>>, vector<4x16xf32>
    tpu.vector_store %arg7[%c4_79, %c0_80], %98 {strides = array<i32>} : memref<28x16xf32, #tpu.memory_space<vmem>>, vector<4x16xf32>,
    %c0_81 = arith.constant 0 : index
    %c2_82 = arith.constant 2 : index
    %100 = vector.load %arg6[%c0_81, %c2_82] : memref<4x22xf32, #tpu.memory_space<vmem>>, vector<4x16xf32>
    %c8_83 = arith.constant 8 : index
    %c0_84 = arith.constant 0 : index
    %101 = vector.load %arg7[%c8_83, %c0_84] : memref<28x16xf32, #tpu.memory_space<vmem>>, vector<4x16xf32>
    tpu.vector_store %arg7[%c8_83, %c0_84], %100 {strides = array<i32>} : memref<28x16xf32, #tpu.memory_space<vmem>>, vector<4x16xf32>,
    %c0_85 = arith.constant 0 : index
    %c3_86 = arith.constant 3 : index
    %102 = vector.load %arg6[%c0_85, %c3_86] : memref<4x22xf32, #tpu.memory_space<vmem>>, vector<4x16xf32>
    %c12_87 = arith.constant 12 : index
    %c0_88 = arith.constant 0 : index
    %103 = vector.load %arg7[%c12_87, %c0_88] : memref<28x16xf32, #tpu.memory_space<vmem>>, vector<4x16xf32>
    tpu.vector_store %arg7[%c12_87, %c0_88], %102 {strides = array<i32>} : memref<28x16xf32, #tpu.memory_space<vmem>>, vector<4x16xf32>,
    %c0_89 = arith.constant 0 : index
    %c4_90 = arith.constant 4 : index
    %104 = vector.load %arg6[%c0_89, %c4_90] : memref<4x22xf32, #tpu.memory_space<vmem>>, vector<4x16xf32>
    %c16_91 = arith.constant 16 : index
    %c0_92 = arith.constant 0 : index
    %105 = vector.load %arg7[%c16_91, %c0_92] : memref<28x16xf32, #tpu.memory_space<vmem>>, vector<4x16xf32>
    tpu.vector_store %arg7[%c16_91, %c0_92], %104 {strides = array<i32>} : memref<28x16xf32, #tpu.memory_space<vmem>>, vector<4x16xf32>,
    %c0_93 = arith.constant 0 : index
    %c5_94 = arith.constant 5 : index
    %106 = vector.load %arg6[%c0_93, %c5_94] : memref<4x22xf32, #tpu.memory_space<vmem>>, vector<4x16xf32>
    %c20_95 = arith.constant 20 : index
    %c0_96 = arith.constant 0 : index
    %107 = vector.load %arg7[%c20_95, %c0_96] : memref<28x16xf32, #tpu.memory_space<vmem>>, vector<4x16xf32>
    tpu.vector_store %arg7[%c20_95, %c0_96], %106 {strides = array<i32>} : memref<28x16xf32, #tpu.memory_space<vmem>>, vector<4x16xf32>,
    %c0_97 = arith.constant 0 : index
    %c6_98 = arith.constant 6 : index
    %108 = vector.load %arg6[%c0_97, %c6_98] : memref<4x22xf32, #tpu.memory_space<vmem>>, vector<4x16xf32>
    %c24_99 = arith.constant 24 : index
    %c0_100 = arith.constant 0 : index
    %109 = vector.load %arg7[%c24_99, %c0_100] : memref<28x16xf32, #tpu.memory_space<vmem>>, vector<4x16xf32>
    tpu.vector_store %arg7[%c24_99, %c0_100], %108 {strides = array<i32>} : memref<28x16xf32, #tpu.memory_space<vmem>>, vector<4x16xf32>,
    %c0_101 = arith.constant 0 : index
    %c0_102 = arith.constant 0 : index
    %110 = vector.load %arg7[%c0_101, %c0_102] : memref<28x16xf32, #tpu.memory_space<vmem>>, vector<28x16xf32>
    %cst_103 = arith.constant dense<0.000000e+00> : vector<4x16xf32>
    %111 = tpu.matmul %3, %110, %cst_103 {dimension_numbers = #tpu.dot_dimension_numbers<[1], [0], [0], [1], [0, 0, 1, 1], [], []>} : vector<4x28xf32>, vector<28x16xf32>, vector<4x16xf32> -> vector<4x16xf32>
    %112 = vector.broadcast %82 : f32 to vector<4x16xf32>
    %113 = arith.mulf %111, %112 : vector<4x16xf32>
    %114 = vector.broadcast %83 : f32 to vector<4x16xf32>
    %115 = arith.addf %113, %114 : vector<4x16xf32>
    %116 = arith.negf %115 : vector<4x16xf32>
    %117 = math.exp %116 : vector<4x16xf32>
    %cst_104 = arith.constant 1.000000e+00 : f32
    %118 = vector.broadcast %cst_104 : f32 to vector<4x16xf32>
    %119 = arith.addf %118, %117 : vector<4x16xf32>
    %120 = arith.divf %118, %119 : vector<4x16xf32>
    %121 = vector.shape_cast %120 : vector<4x16xf32> to vector<4x16x1xf32>
    %122 = vector.broadcast %121 : vector<4x16x1xf32> to vector<4x16x16xf32>
    %123 = arith.mulf %5, %122 : vector<4x16x16xf32>
    %c0_105 = arith.constant 0 : index
    %c0_106 = arith.constant 0 : index
    %c0_107 = arith.constant 0 : index
    %c0_108 = arith.constant 0 : index
    %124 = vector.load %arg5[%c0_105, %c0_106, %c0_107, %c0_108] : memref<1x4x16x16xf32, #tpu.memory_space<vmem>>, vector<1x4x16x16xf32>
    %125 = vector.shape_cast %124 : vector<1x4x16x16xf32> to vector<4x16x16xf32>
    %126 = vector.shape_cast %123 : vector<4x16x16xf32> to vector<1x4x16x16xf32>
    tpu.vector_store %arg5[%c0_105, %c0_106, %c0_107, %c0_108], %126 {strides = array<i32>} : memref<1x4x16x16xf32, #tpu.memory_space<vmem>>, vector<1x4x16x16xf32>,
    return
  }
  func.func @transform_0(%arg0: i32) -> (i32, i32) {
    %c0_i32 = arith.constant 0 : i32
    %c0_i32_0 = arith.constant 0 : i32
    %c0_i32_1 = arith.constant 0 : i32
    return %c0_i32, %c0_i32_0 : i32, i32
  }
  func.func @transform_1(%arg0: i32) -> (i32, i32, i32) {
    %c0_i32 = arith.constant 0 : i32
    %c0_i32_0 = arith.constant 0 : i32
    %c0_i32_1 = arith.constant 0 : i32
    %c0_i32_2 = arith.constant 0 : i32
    return %c0_i32, %c0_i32_0, %c0_i32_1 : i32, i32, i32
  }
  func.func @transform_2(%arg0: i32) -> (i32, i32, i32, i32) {
    %c0_i32 = arith.constant 0 : i32
    %c0_i32_0 = arith.constant 0 : i32
    %c0_i32_1 = arith.constant 0 : i32
    %c0_i32_2 = arith.constant 0 : i32
    return %arg0, %c0_i32, %c0_i32_0, %c0_i32_1 : i32, i32, i32, i32
  }
  func.func @transform_3(%arg0: i32) -> (i32, i32, i32, i32) {
    %c0_i32 = arith.constant 0 : i32
    %c0_i32_0 = arith.constant 0 : i32
    %c0_i32_1 = arith.constant 0 : i32
    %c0_i32_2 = arith.constant 0 : i32
    return %arg0, %c0_i32, %c0_i32_0, %c0_i32_1 : i32, i32, i32, i32
  }
  func.func @transform_4(%arg0: i32) -> (i32, i32, i32, i32) {
    %c0_i32 = arith.constant 0 : i32
    %c0_i32_0 = arith.constant 0 : i32
    %c0_i32_1 = arith.constant 0 : i32
    %c0_i32_2 = arith.constant 0 : i32
    return %arg0, %c0_i32, %c0_i32_0, %c0_i32_1 : i32, i32, i32, i32
  }
}

</mosaic_0001>

<bundles_post_ra>
// kernel: adib_block_forward.1
= control target key start
LH: loop header
LB: loop body
LE: loop exit
PB: predicated region body
PF: predicated region fallthrough
CT: control target
= control target key end

     0   :  { %10 = vsyncpa [#allocation6], 0  ;;  %s2022_s0 = inlined_call_operand.vmem [shape: f32[2,4], index: 0, kind: input, shape index: {}]   ;;  %s2023_s1 = inlined_call_operand.vmem [shape: f32[2,4,28], index: 1, kind: input, shape index: {}]   ;;  %s2024_s2 = inlined_call_operand.vmem [shape: f32[2,4,16,16], index: 2, kind: input, shape index: {}]   ;;  %s2025_s3 = inlined_call_operand.hbm [shape: f32[2,4,16,16], index: 3, kind: output, shape index: {0}]   ;;  %s2026_s4 = inlined_call_operand.hbm [shape: f32[2,4,16,16], index: 4, kind: output, shape index: {1}]  }
   0x1   :  { %11 = vsyncpa [#allocation5], 0 }
   0x2   :  { %13 = vsyncpa [#allocation5 + $0x1], 0 }
   0x3   :  { %14 = vsyncpa [#allocation9], 0 }
   0x4   :  { %16 = vsyncpa [#allocation9 + $0x1], 0  ;;  %s1503_s15 = smov 0   ;;  %s1505_s16 = smov 0  }
   0x5   :  { %s1507_s17 = smov 0   ;;  %s1509_s18 = smov 0  }
   0x6 LB: > { %s1524_s19 = sadd.s32 4294967295, %s1461_s18   ;;  %s1178_s20 = sadd.s32 4294967294, %s1461_s18   ;;  %s1461_s18 = sphi %s1509_s18, %s2033_s18   ;;  %s1457_s17 = sphi %s1507_s17, %s2032_s17   ;;  %s1453_s16 = sphi %s1505_s16, %s2031_s16   ;;  %s1449_s15 = sphi %s1503_s15, %s2030_s15  }
   0x7   : > { %s1528_s21 = sadd.s32 1, %s1461_s18   ;;  %s97_s22 = sadd.s32 1, %s1457_s17 }
   0x8   : > { %s94_s23 = ssub.s32 %s1461_s18, %s1528_s21  ;;  %p107_p0 = scmp.ne.s32.totalorder %s1457_s17, %s1453_s16 }
   0x9   : > { %p95_p1 = scmp.eq.s32.totalorder %s94_s23, 0  ;;  %p108_p2 = scmp.eq.s32.totalorder %s1524_s19, 1 }
   0xa   : > { %p113_p3 = scmp.ne.s32.totalorder %s1453_s16, %s1449_s15  ;;  %p114_p4 = scmp.eq.s32.totalorder %s1178_s20, 1 }
   0xb   : > { %s1539_s24 = scalar_select %p95_p1, %s1457_s17, %s97_s22  }
   0xc   : > { %p1541_p5 = por %p108_p2, %p107_p0  ;;  %p1545_p6 = por %p114_p4, %p113_p3 }
   0xd   : > { %p1179_p7 = scmp.ge.s32.totalorder %s1461_s18, 1  ;;  %p147_p8 = scmp.lt.s32.totalorder %s1461_s18, 3 }
   0xe   : > { %p1264_p9 = scmp.eq.s32.totalorder %s1524_s19, 0  ;;  %s160_s30 = sshll.u32 %s2022_s0, 4  ;;  %s161_s30 = int_to_ptr.vmem [resolvable:$true] %s160_s30 }
   0xf   : > { %p1552_p10 = pnand %p1179_p7, %p147_p8  ;;  %s1352_s5 = scalar_lea.vmem %s161_s30, 32 }
  0x10   : > { %p1353_p13 = scmp.ne.s32.totalorder %s161_s30, %s1352_s5  ;;  %p1360_p3 = scmp.lt.s32.totalorder %s161_s30, %s161_s30 }
  0x11   : > { %p1253_p11 = pneg %p1552_p10  ;;  %p1361_p4 = scmp.lt.s32.totalorder %s1352_s5, %s1352_s5 }
  0x13   : > { %p1254_p12 = pnand %p1264_p9, %p1253_p11  ;;  %p1362_p7 = por %p1361_p4, %p1360_p3 }
  0x15   : > { %p1354_p0 = pneg %p1254_p12 }
  0x17   : > { %p1355_p1 = pnand %p1354_p0, %p1353_p13 }
  0x19   : > { %p1356_p2 = pneg %p1355_p1 }
  0x1b   : > { %p1363_p8 = pnand %p1362_p7, %p1356_p2 }
  0x1d   : > { %1366 = shalt.err (!%p1363_p8)
}
  0x1e   : > { %s1463_s6 = smov [#allocation4]   ;;  %184 = sbr.rel (%p1552_p10) target bundleno = 777 (0x309), region = 32 }
  0x1f   : > { %1256 = dma.vmem_to_smem (!%p1254_p12), %s161_s30, 32, %s1463_s6, [#allocation6]  }
  0x23   : > { %1436 = dma.done.wait (%p1264_p9), [#allocation6], 32  }
  0x24   : > { %1438 = vsyncadd (%p1264_p9), [#allocation6], 4294967264 }
  0x25   : > { %190 = sfence }
  0x26   : > { %p216_p11 = scmp.lt.s32.totalorder %s1524_s19, 1  ;;  %vm240_vm0 = vcmask 130048   ;;  %s365_s12 = sld [smem:[#allocation4]]  ;;  %vm395_vm8 = vcmask 175104   ;;  %vm401_vm10 = vcmask 1041409   ;;  %vm403_vm11 = vcmask 1042434  }
  0x27   : > { %s1189_s13 = sld [smem:[#allocation4 + $0x1]]  ;;  %vm405_vm12 = vcmask 1043459   ;;  %s1465_s14 = smov 3   ;;  %vm410_vm13 = vcmask 150552   ;;  %vm413_vm15 = vcmask 125952  }
  0x28   : > { %s217_s7 = scalar_select %p216_p11, %s1524_s19, 1 }
  0x29   : > { %s1196_s20 = sld [smem:[#allocation4 + $0x81]]  ;;  %s1466_s23 = smov 122  }
  0x2a   : > { %s1210_s8 = sshll.u32 %s217_s7, 6  ;;  %s1195_s22 = sld [smem:[#allocation4 + $0x80]] }
  0x2b   : > { %s1574_s11 = scalar_lea.vmem %s2024_s2, %s1210_s8  ;;  %s1467_s27 = smov 126  }
  0x2c   : > { %v226_v0 = vld [vmem:[%s1574_s11 + $0x10] sm:$0xff]  ;;  %v224_v1 = vld [vmem:[%s1574_s11] sm:$0xff]  ;;  %v227_v2 = vld [vmem:[%s1574_s11 + $0x18] sm:$0xff]  ;;  %s1468_s28 = smov 124   ;;  %s1469_s29 = smov 127  }
  0x2d   : > { %v250_v3 = vsel %vm240_vm0, %v226_v0, 0.0  ;;  %v241_v4 = vsel %vm240_vm0, %v224_v1, 0.0  ;;  %v251_v5 = vsel %vm240_vm0, %v227_v2, 0.0  ;;  %v225_v6 = vld [vmem:[%s1574_s11 + $0x8] sm:$0xff]  ;;  %v228_v8 = vld [vmem:[%s1574_s11 + $0x20] sm:$0xff]  ;;  %v232_v9 = vmul.f32 %v224_v1, %v224_v1  ;;  %v231_v14 = vld [vmem:[%s1574_s11 + $0x38] sm:$0xff] }
  0x2e   : > { %v229_v7 = vld [vmem:[%s1574_s11 + $0x28] sm:$0xff]  ;;  %608 = vadd.xlane.f32.xlu1 %v250_v3  ;;  %604 = vadd.xlane.f32.xlu0 %v241_v4  ;;  %v252_v10 = vadd.f32 %v251_v5, %v250_v3  ;;  %v242_v11 = vsel %vm240_vm0, %v225_v6, 0.0  ;;  %v259_v13 = vsel %vm240_vm0, %v228_v8, 0.0  ;;  %v230_v15 = vld [vmem:[%s1574_s11 + $0x30] sm:$0xff]  ;;  %v269_v18 = vsel %vm240_vm0, %v231_v14, 0.0  ;;  %s1470_s30 = smov 123  }
  0x2f   : > { %v260_v12 = vsel %vm240_vm0, %v229_v7, 0.0  ;;  %v243_v16 = vadd.f32 %v242_v11, %v241_v4  ;;  %v268_v19 = vsel %vm240_vm0, %v230_v15, 0.0  ;;  %v233_v22 = vmul.f32 %v225_v6, %v225_v6  ;;  %s1471_s5 = smov 125   ;;  %s1190_s10 = sld [smem:[#allocation4 + $0x2]] }
  0x30   : > { %v261_v17 = vadd.f32 %v260_v12, %v259_v13  ;;  %v253_v20 = vrot.slane %v252_v10, 4  ;;  %v270_v21 = vadd.f32 %v269_v18, %v268_v19  ;;  %v277_v23 = vsel %vm240_vm0, %v232_v9, 0.0  ;;  %s1474_s7 = smov [#allocation7]  }
  0x31   : > { %v244_v24 = vrot.slane %v243_v16, 4  ;;  %v235_v26 = vmul.f32 %v227_v2, %v227_v2  ;;  %v234_v27 = vmul.f32 %v226_v0, %v226_v0  ;;  %v278_v30 = vsel %vm240_vm0, %v233_v22, 0.0  ;;  %s1371_s8 = sshll.u32 %s1474_s7, 4  ;;  %s1372_s8 = int_to_ptr.vmem [resolvable:$false] %s1371_s8 }
  0x32   : > { %v262_v25 = vrot.slane %v261_v17, 4  ;;  %610 = vadd.xlane.f32.xlu1 %v251_v5  ;;  %v254_v28 = vadd.f32 %v253_v20, %v252_v10  ;;  %606 = vadd.xlane.f32.xlu0 %v242_v11  ;;  %v271_v29 = vrot.slane %v270_v21, 4  ;;  %v237_v31 = vmul.f32 %v229_v7, %v229_v7  ;;  %s1373_s9 = scalar_lea.vmem %s1372_s8, 2048 }
  0x33   : > { %v245_v32 = vadd.f32 %v244_v24, %v243_v16  ;;  %v279_v34 = vadd.f32 %v278_v30, %v277_v23  ;;  %v287_v35 = vsel %vm240_vm0, %v235_v26, 0.0  ;;  %v286_v38 = vsel %vm240_vm0, %v234_v27, 0.0 }
  0x34   : > { %v263_v33 = vadd.f32 %v262_v25, %v261_v17  ;;  %v255_v36 = vrot.slane %v254_v28, 2  ;;  %v272_v37 = vadd.f32 %v271_v29, %v270_v21  ;;  %v1597_v39 = vsel %vm240_vm0, %v237_v31, 0.0 }
  0x35   : > { %v246_v40 = vrot.slane %v245_v32, 2  ;;  %v280_v42 = vrot.slane %v279_v34, 4  ;;  %v288_v43 = vadd.f32 %v287_v35, %v286_v38  ;;  %v236_v46 = vmul.f32 %v228_v8, %v228_v8 }
  0x36   : > { %v264_v41 = vrot.slane %v263_v33, 2  ;;  %v256_v44 = vadd.f32 %v255_v36, %v254_v28  ;;  %614 = vadd.xlane.f32.xlu1 %v260_v12  ;;  %612 = vadd.xlane.f32.xlu0 %v259_v13  ;;  %v273_v45 = vrot.slane %v272_v37, 2  ;;  %v239_v47 = vmul.f32 %v231_v14, %v231_v14 }
  0x37   : > { %v247_v48 = vadd.f32 %v246_v40, %v245_v32  ;;  %v281_v50 = vadd.f32 %v280_v42, %v279_v34  ;;  %v289_v51 = vrot.slane %v288_v43, 4  ;;  %v295_v54 = vsel %vm240_vm0, %v236_v46, 0.0 }
  0x38   : > { %v265_v49 = vadd.f32 %v264_v41, %v263_v33  ;;  %v257_v52 = vrot.slane %v256_v44, 1  ;;  %v274_v53 = vadd.f32 %v273_v45, %v272_v37  ;;  %v305_v55 = vsel %vm240_vm0, %v239_v47, 0.0 }
  0x39   : > { %v248_v56 = vrot.slane %v247_v48, 1  ;;  %v282_v58 = vrot.slane %v281_v50, 2  ;;  %v290_v59 = vadd.f32 %v289_v51, %v288_v43  ;;  %v297_v62 = vadd.f32 %v1597_v39, %v295_v54 }
  0x3a   : > { %v266_v57 = vrot.slane %v265_v49, 1  ;;  %v258_v60 = vadd.f32 %v257_v52, %v256_v44  ;;  %618 = vadd.xlane.f32.xlu1 %v269_v18  ;;  %v275_v61 = vrot.slane %v274_v53, 1  ;;  %616 = vadd.xlane.f32.xlu0 %v268_v19  ;;  %v238_v63 = vmul.f32 %v230_v15, %v230_v15 }
  0x3b   : > { %v249_v0 = vadd.f32 %v248_v56, %v247_v48  ;;  %v283_v2 = vadd.f32 %v282_v58, %v281_v50  ;;  %v291_v3 = vrot.slane %v290_v59, 2  ;;  %v298_v6 = vrot.slane %v297_v62, 4 }
  0x3c   : > { %v267_v1 = vadd.f32 %v266_v57, %v265_v49  ;;  %v1602_v4 = vmul.f32 0.0625, %v258_v60  ;;  %v276_v5 = vadd.f32 %v275_v61, %v274_v53  ;;  %v304_v7 = vsel %vm240_vm0, %v238_v63, 0.0 }
  0x3d   : > { %v1605_v8 = vmul.f32 0.0625, %v249_v0  ;;  %v284_v10 = vrot.slane %v283_v2, 1  ;;  %v292_v11 = vadd.f32 %v291_v3, %v290_v59  ;;  %v299_v13 = vadd.f32 %v298_v6, %v297_v62 }
  0x3e   : > { %v1607_v9 = vmul.f32 0.0625, %v267_v1  ;;  %622 = vadd.xlane.f32.xlu1 %v278_v30  ;;  %620 = vadd.xlane.f32.xlu0 %v277_v23  ;;  %v318_v12 = vmul.f32 16.0, %v1602_v4  ;;  %v306_v14 = vadd.f32 %v305_v55, %v304_v7  ;;  %v1610_v15 = vmul.f32 0.0625, %v276_v5 }
  0x3f   : > { %v317_v16 = vmul.f32 16.0, %v1605_v8  ;;  %v285_v17 = vadd.f32 %v284_v10, %v283_v2  ;;  %v293_v18 = vrot.slane %v292_v11, 1  ;;  %v300_v20 = vrot.slane %v299_v13, 2 }
  0x40   : > { %v322_v19 = vmul.f32 %v318_v12, %v1602_v4  ;;  %v319_v21 = vmul.f32 16.0, %v1607_v9  ;;  %v307_v22 = vrot.slane %v306_v14, 4  ;;  %v320_v32 = vmul.f32 16.0, %v1610_v15 }
  0x41   : > { %v321_v24 = vmul.f32 %v317_v16, %v1605_v8  ;;  %v294_v25 = vadd.f32 %v293_v18, %v292_v11  ;;  %v301_v23 = vadd.f32 %v300_v20, %v299_v13  ;;  %v386_v58 = vstv %s1189_s13  ;;  %s1197_s13 = sld [smem:[#allocation4 + $0x82]] }
  0x42   : > { %626 = vadd.xlane.f32.xlu1 %v287_v35  ;;  %624 = vadd.xlane.f32.xlu0 %v286_v38  ;;  %v308_v26 = vadd.f32 %v307_v22, %v306_v14  ;;  %v323_v30 = vmul.f32 %v319_v21, %v1607_v9  ;;  %v324_v42 = vmul.f32 %v320_v32, %v1610_v15  ;;  %v1464_v16 = vmov 0.0  }
  0x43   : > { %v325_v27 = vsub.f32 %v285_v17, %v321_v24  ;;  %v326_v28 = vsub.f32 %v294_v25, %v322_v19  ;;  %v302_v29 = vrot.slane %v301_v23, 1  ;;  %v387_v5 = vmul.f32 %v386_v58, %v1605_v8  ;;  %396 = vst.msk [vmem:[#allocation2] sm:$0xf] %vm395_vm8, %v1464_v16  ;;  %1223 = vmatprep.subr.mxu0 %v1464_v16 }
  0x44   : > { %v309_v31 = vrot.slane %v308_v26, 2  ;;  %v388_v6 = vmul.f32 %v386_v58, %v1602_v4  ;;  %1234 = vmatprep.subr.mxu1 %v1464_v16  ;;  %v389_v19 = vmul.f32 %v386_v58, %v1607_v9 }
  0x45   : > { %v329_v33 = vmax.f32 %v325_v27, 0.0  ;;  %v330_v34 = vmax.f32 %v326_v28, 0.0  ;;  %v303_v36 = vadd.f32 %v302_v29, %v301_v23  ;;  %v390_v29 = vmul.f32 %v386_v58, %v1610_v15 }
  0x46   : > { %630 = vadd.xlane.f32.xlu1 %v1597_v39  ;;  %628 = vadd.xlane.f32.xlu0 %v295_v54  ;;  %v310_v37 = vadd.f32 %v309_v31, %v308_v26  ;;  %v377_v54 = vstv %s365_s12  ;;  %s1191_s12 = sld [smem:[#allocation4 + $0x3]] }
  0x47   : > { %v333_v40 = vmul.f32 0.06666667, %v329_v33  ;;  %v334_v35 = vmul.f32 0.06666667, %v330_v34  ;;  %v327_v38 = vsub.f32 %v303_v36, %v323_v30 }
  0x48   : > { %v311_v41 = vrot.slane %v310_v37, 1 }
  0x49   : > { %1312 = vrsqrt.f32 %v333_v40  ;;  %v331_v43 = vmax.f32 %v327_v38, 0.0  ;;  %vm339_vm1 = vcmp.eq.f32.partialorder %v333_v40, inf  ;;  %v342_v49 = vand.u32 2147483648, %v333_v40 }
  0x4a   : > { %1314 = vrsqrt.f32 %v334_v35  ;;  %634 = vadd.xlane.f32.xlu1 %v305_v55  ;;  %v312_v44 = vadd.f32 %v311_v41, %v310_v37  ;;  %632 = vadd.xlane.f32.xlu0 %v304_v7  ;;  %vm341_vm2 = vcmp.eq.f32.partialorder %v333_v40, 0.0  ;;  %vm346_vm3 = vcmp.eq.f32.partialorder %v334_v35, inf }
  0x4b   : > { %v335_v45 = vmul.f32 0.06666667, %v331_v43  ;;  %v349_v52 = vand.u32 2147483648, %v334_v35  ;;  %vm348_vm4 = vcmp.eq.f32.partialorder %v334_v35, 0.0 }
  0x4c   : > { %v328_v46 = vsub.f32 %v312_v44, %v324_v42 }
  0x4d   : > { %1316 = vrsqrt.f32 %v335_v45  ;;  %vm353_vm5 = vcmp.eq.f32.partialorder %v335_v45, inf  ;;  %v356_v61 = vand.u32 2147483648, %v335_v45  ;;  %vm355_vm6 = vcmp.eq.f32.partialorder %v335_v45, 0.0 }
  0x4e   : > { %v332_v47 = vmax.f32 %v328_v46, 0.0 }
  0x50   : > { %v336_v39 = vmul.f32 0.06666667, %v332_v47 }
  0x52   : > { %1318 = vrsqrt.f32 %v336_v39  ;;  %vm360_vm7 = vcmp.eq.f32.partialorder %v336_v39, inf  ;;  %vm362_vm9 = vcmp.eq.f32.partialorder %v336_v39, 0.0  ;;  %v363_v13 = vand.u32 2147483648, %v336_v39 }
  0x56   : > { %v1313_v48 = vpop.eup %1312 }
  0x57   : > { %v1315_v50 = vpop.eup %1314  ;;  %v338_v51 = vmul.f32 %v1313_v48, %v333_v40 }
  0x58   : > { %v345_v53 = vmul.f32 %v1315_v50, %v334_v35 }
  0x59   : > { %v340_v55 = vsel %vm339_vm1, %v333_v40, %v338_v51 }
  0x5a   : > { %v343_v56 = vsel %vm341_vm2, %v342_v49, %v340_v55  ;;  %v347_v57 = vsel %vm346_vm3, %v334_v35, %v345_v53  ;;  %v1317_v59 = vpop.eup %1316 }
  0x5b   : > { %v350_v60 = vsel %vm348_vm4, %v349_v52, %v347_v57  ;;  %v369_v62 = vadd.f32 %v343_v56, %v1605_v8  ;;  %v378_v63 = vmul.f32 %v377_v54, %v343_v56  ;;  %v352_v0 = vmul.f32 %v1317_v59, %v335_v45 }
  0x5c   : > { %v370_v1 = vadd.f32 %v350_v60, %v1602_v4  ;;  %v379_v2 = vmul.f32 %v377_v54, %v350_v60 }
  0x5d   : > { %v373_v3 = vmul.f32 0.5, %v369_v62  ;;  %v354_v7 = vsel %vm353_vm5, %v335_v45, %v352_v0 }
  0x5e   : > { %v374_v10 = vmul.f32 0.5, %v370_v1  ;;  %v357_v12 = vsel %vm355_vm6, %v356_v61, %v354_v7 }
  0x5f   : > { %v1319_v11 = vpop.eup %1318  ;;  %v382_v14 = vadd.f32 %v378_v63, %v373_v3  ;;  %v371_v8 = vadd.f32 %v357_v12, %v1607_v9  ;;  %v380_v4 = vmul.f32 %v377_v54, %v357_v12 }
  0x60   : > { %v359_v17 = vmul.f32 %v1319_v11, %v336_v39  ;;  %v383_v18 = vadd.f32 %v379_v2, %v374_v10 }
  0x61   : > { %v375_v21 = vmul.f32 0.5, %v371_v8  ;;  %v391_v22 = vadd.f32 %v387_v5, %v382_v14 }
  0x62   : > { %v361_v20 = vsel %vm360_vm7, %v336_v39, %v359_v17  ;;  %v392_v24 = vadd.f32 %v388_v6, %v383_v18 }
  0x63   : > { %v364_v25 = vsel %vm362_vm9, %v363_v13, %v361_v20  ;;  %v384_v27 = vadd.f32 %v380_v4, %v375_v21  ;;  %v547_v13 = vlaneseq }
  0x64   : > { %v372_v23 = vadd.f32 %v364_v25, %v1610_v15  ;;  %v381_v26 = vmul.f32 %v377_v54, %v364_v25  ;;  %v402_v31 = vsel %vm401_vm10, %v392_v24, %v391_v22 }
  0x65   : > { %v393_v30 = vadd.f32 %v389_v19, %v384_v27 }
  0x66   : > { %v376_v28 = vmul.f32 0.5, %v372_v23 }
  0x67   : > { %v404_v32 = vsel %vm403_vm11, %v393_v30, %v402_v31 }
  0x68   : > { %v385_v9 = vadd.f32 %v381_v26, %v376_v28  ;;  %v804_v26 = vand.u32 127, %v547_v13 }
  0x6a   : > { %v394_v33 = vadd.f32 %v390_v29, %v385_v9 }
  0x6c   : > { %v406_v34 = vsel %vm405_vm12, %v394_v33, %v404_v32 }
  0x6d   : > { %407 = vrot.lane.b32.xlu0 %v406_v34, %s1465_s14  ;;  %v1685_v34 = vshrl.u32 %v547_v13, 7  ;;  %s1198_s14 = sld [smem:[#allocation4 + $0x83]] }
  0xb7   : > { %v609_v36 = vpop.xlane.xlu1 %608  ;;  %v605_v37 = vpop.xlane.xlu0 %604 }
  0xb8   : > { %v1637_v38 = vmul.f32 0.0625, %v605_v37  ;;  %v1641_v43 = vmul.f32 0.0625, %v609_v36  ;;  %v810_v36 = vadd.s32 4294967285, %v804_v26  ;;  %v805_v37 = vadd.s32 4294967293, %v804_v26 }
  0xba   : > { %v644_v46 = vmul.f32 16.0, %v1637_v38  ;;  %v646_v49 = vmul.f32 16.0, %v1641_v43 }
  0xbb   : > { %v611_v40 = vpop.xlane.xlu1 %610  ;;  %v607_v35 = vpop.xlane.xlu0 %606 }
  0xbc   : > { %v1639_v41 = vmul.f32 0.0625, %v607_v35  ;;  %v1643_v44 = vmul.f32 0.0625, %v611_v40  ;;  %v652_v53 = vmul.f32 %v644_v46, %v1637_v38  ;;  %v654_v59 = vmul.f32 %v646_v49, %v1641_v43 }
  0xbd   : > { %v1689_v40 = vstv %s1196_s20  ;;  %v1694_v46 = vsub.s32 %v810_v36, %v1685_v34  ;;  %s1902_s20 = sand.u32 1, %s1453_s16  }
  0xbe   : > { %v645_v45 = vmul.f32 16.0, %v1639_v41  ;;  %v647_v48 = vmul.f32 16.0, %v1643_v44 }
  0xbf   : > { %v615_v15 = vpop.xlane.xlu1 %614  ;;  %v613_v42 = vpop.xlane.xlu0 %612 }
  0xc0   : > { %v1649_v50 = vmul.f32 0.0625, %v615_v15  ;;  %v1651_v51 = vmul.f32 0.0625, %v613_v42  ;;  %v653_v52 = vmul.f32 %v645_v45, %v1639_v41  ;;  %v655_v58 = vmul.f32 %v647_v48, %v1643_v44 }
  0xc1   : > { %v1691_v45 = vstv %s1195_s22  ;;  %v1698_v48 = vsub.s32 %v805_v37, %v1685_v34  ;;  %s1184_s22 = sshll.u32 %s1902_s20, 6 }
  0xc2   : > { %v649_v62 = vmul.f32 16.0, %v1649_v50  ;;  %v648_v63 = vmul.f32 16.0, %v1651_v51 }
  0xc3   : > { %v619_v47 = vpop.xlane.xlu1 %618  ;;  %v617_v39 = vpop.xlane.xlu0 %616 }
  0xc4   : > { %v1659_v0 = vmul.f32 0.0625, %v619_v47  ;;  %v1661_v1 = vmul.f32 0.0625, %v617_v39  ;;  %v657_v11 = vmul.f32 %v649_v62, %v1649_v50  ;;  %v656_v12 = vmul.f32 %v648_v63, %v1651_v51 }
  0xc6   : > { %v651_v8 = vmul.f32 16.0, %v1659_v0  ;;  %v650_v4 = vmul.f32 16.0, %v1661_v1 }
  0xc7   : > { %v623_v54 = vpop.xlane.xlu1 %622  ;;  %v621_v55 = vpop.xlane.xlu0 %620 }
  0xc8   : > { %v661_v56 = vsub.f32 %v623_v54, %v653_v52  ;;  %v660_v57 = vsub.f32 %v621_v55, %v652_v53  ;;  %v659_v29 = vmul.f32 %v651_v8, %v1659_v0  ;;  %v658_v30 = vmul.f32 %v650_v4, %v1661_v1 }
  0xc9   : > { %v1706_v53 = vmul.f32 %v1689_v40, %v1641_v43  ;;  %v1710_v54 = vmul.f32 %v1689_v40, %v1637_v38 }
  0xca   : > { %v669_v60 = vmax.f32 %v661_v56, 0.0  ;;  %v668_v61 = vmax.f32 %v660_v57, 0.0  ;;  %v1716_v56 = vmul.f32 %v1689_v40, %v1643_v44 }
  0xcb   : > { %v627_v2 = vpop.xlane.xlu1 %626  ;;  %v625_v3 = vpop.xlane.xlu0 %624 }
  0xcc   : > { %v1663_v5 = vmul.f32 0.06666667, %v669_v60  ;;  %v1665_v6 = vmul.f32 0.06666667, %v668_v61  ;;  %v663_v7 = vsub.f32 %v627_v2, %v655_v58  ;;  %v662_v10 = vsub.f32 %v625_v3, %v654_v59 }
  0xce   : > { %1320 = vrsqrt.f32 %v1663_v5  ;;  %v671_v18 = vmax.f32 %v663_v7, 0.0  ;;  %v670_v19 = vmax.f32 %v662_v10, 0.0  ;;  %vm693_vm14 = vcmp.eq.f32.partialorder %v1663_v5, inf }
  0xcf   : > { %1322 = vrsqrt.f32 %v1665_v6  ;;  %v631_v14 = vpop.xlane.xlu1 %630  ;;  %v629_v17 = vpop.xlane.xlu0 %628  ;;  %vm686_vm1 = vcmp.eq.f32.partialorder %v1665_v6, inf  ;;  %vm695_vm2 = vcmp.eq.f32.partialorder %v1663_v5, 0.0  ;;  %v696_v58 = vand.u32 2147483648, %v1663_v5 }
  0xd0   : > { %v665_v20 = vsub.f32 %v631_v14, %v657_v11  ;;  %v664_v21 = vsub.f32 %v629_v17, %v656_v12  ;;  %v1673_v22 = vmul.f32 0.06666667, %v671_v18  ;;  %v1675_v24 = vmul.f32 0.06666667, %v670_v19 }
  0xd1   : > { %vm688_vm3 = vcmp.eq.f32.partialorder %v1665_v6, 0.0  ;;  %v689_v61 = vand.u32 2147483648, %v1665_v6 }
  0xd2   : > { %v673_v25 = vmax.f32 %v665_v20, 0.0  ;;  %v672_v23 = vmax.f32 %v664_v21, 0.0  ;;  %1324 = vrsqrt.f32 %v1673_v22  ;;  %vm707_vm4 = vcmp.eq.f32.partialorder %v1673_v22, inf }
  0xd3   : > { %v635_v27 = vpop.xlane.xlu1 %634  ;;  %v633_v28 = vpop.xlane.xlu0 %632  ;;  %1326 = vrsqrt.f32 %v1675_v24  ;;  %vm709_vm5 = vcmp.eq.f32.partialorder %v1673_v22, 0.0  ;;  %v710_v2 = vand.u32 2147483648, %v1673_v22  ;;  %vm700_vm6 = vcmp.eq.f32.partialorder %v1675_v24, inf }
  0xd4   : > { %v1681_v31 = vmul.f32 0.06666667, %v673_v25  ;;  %v1683_v9 = vmul.f32 0.06666667, %v672_v23  ;;  %v667_v32 = vsub.f32 %v635_v27, %v659_v29  ;;  %v666_v33 = vsub.f32 %v633_v28, %v658_v30 }
  0xd5   : > { %vm702_vm7 = vcmp.eq.f32.partialorder %v1675_v24, 0.0 }
  0xd6   : > { %1328 = vrsqrt.f32 %v1681_v31  ;;  %v675_v35 = vmax.f32 %v667_v32, 0.0  ;;  %v674_v15 = vmax.f32 %v666_v33, 0.0  ;;  %vm721_vm9 = vcmp.eq.f32.partialorder %v1681_v31, inf }
  0xd7   : > { %1330 = vrsqrt.f32 %v1683_v9  ;;  %v724_v11 = vand.u32 2147483648, %v1681_v31  ;;  %v717_v14 = vand.u32 2147483648, %v1683_v9 }
  0xd8   : > { %v1700_v49 = vmul.f32 0.06666667, %v675_v35  ;;  %v1702_v52 = vmul.f32 0.06666667, %v674_v15 }
  0xda   : > { %1332 = vrsqrt.f32 %v1700_v49  ;;  %v738_v25 = vand.u32 2147483648, %v1700_v49 }
  0xdb   : > { %v1321_v42 = vpop.eup %1320  ;;  %1334 = vrsqrt.f32 %v1702_v52 }
  0xdc   : > { %v1323_v47 = vpop.eup %1322  ;;  %v692_v39 = vmul.f32 %v1321_v42, %v1663_v5 }
  0xdd   : > { %v685_v55 = vmul.f32 %v1323_v47, %v1665_v6 }
  0xde   : > { %v694_v57 = vsel %vm693_vm14, %v1663_v5, %v692_v39  ;;  %vm723_vm14 = vcmp.eq.f32.partialorder %v1681_v31, 0.0 }
  0xdf   : > { %v687_v59 = vsel %vm686_vm1, %v1665_v6, %v685_v55  ;;  %v408_v60 = vpop.permute.xlu0 %407  ;;  %v1325_v62 = vpop.eup %1324  ;;  %v697_v63 = vsel %vm695_vm2, %v696_v58, %v694_v57  ;;  %v703_v6 = vand.u32 2147483648, %v1675_v24  ;;  %vm714_vm1 = vcmp.eq.f32.partialorder %v1683_v9, inf }
  0xe0   : > { %411 = vst.msk [vmem:[#allocation2] sm:$0xf] %vm410_vm13, %v408_v60  ;;  %v1327_v3 = vpop.eup %1326  ;;  %v690_v5 = vsel %vm688_vm3, %v689_v61, %v687_v59  ;;  %v706_v7 = vmul.f32 %v1325_v62, %v1673_v22  ;;  %v745_v12 = vadd.f32 %v697_v63, %v1639_v41  ;;  %vm716_vm2 = vcmp.eq.f32.partialorder %v1683_v9, 0.0 }
  0xe1   : > { %v699_v10 = vmul.f32 %v1327_v3, %v1675_v24  ;;  %v744_v8 = vadd.f32 %v690_v5, %v1637_v38  ;;  %vm735_vm3 = vcmp.eq.f32.partialorder %v1700_v49, inf  ;;  %v779_v38 = vmul.f32 %v1689_v40, %v1639_v41 }
  0xe2   : > { %v708_v13 = vsel %vm707_vm4, %v1673_v22, %v706_v7  ;;  %vm737_vm4 = vcmp.eq.f32.partialorder %v1700_v49, 0.0  ;;  %v783_v22 = vmul.f32 %v1689_v40, %v1649_v50  ;;  %v753_v29 = vmul.f32 0.5, %v745_v12 }
  0xe3   : > { %v1329_v17 = vpop.eup %1328  ;;  %v711_v4 = vsel %vm709_vm5, %v710_v2, %v708_v13  ;;  %v701_v18 = vsel %vm700_vm6, %v1675_v24, %v699_v10  ;;  %v752_v36 = vmul.f32 0.5, %v744_v8  ;;  %v762_v59 = vmul.f32 %v1691_v45, %v697_v63 }
  0xe4   : > { %v1331_v19 = vpop.eup %1330  ;;  %v747_v20 = vadd.f32 %v711_v4, %v1643_v44  ;;  %v704_v21 = vsel %vm702_vm7, %v703_v6, %v701_v18  ;;  %v720_v26 = vmul.f32 %v1329_v17, %v1681_v31  ;;  %v764_v30 = vmul.f32 %v1691_v45, %v711_v4 }
  0xe5   : > { %v746_v23 = vadd.f32 %v704_v21, %v1641_v43  ;;  %v713_v32 = vmul.f32 %v1331_v19, %v1683_v9  ;;  %v782_v43 = vmul.f32 %v1689_v40, %v1651_v51  ;;  %v763_v39 = vmul.f32 %v1691_v45, %v704_v21 }
  0xe6   : > { %v755_v24 = vmul.f32 0.5, %v747_v20  ;;  %v722_v35 = vsel %vm721_vm9, %v1681_v31, %v720_v26  ;;  %v761_v60 = vmul.f32 %v1691_v45, %v690_v5  ;;  %vm728_vm5 = vcmp.eq.f32.partialorder %v1702_v52, inf }
  0xe7   : > { %v412_v27 = vld [vmem:[#allocation2] sm:$0xf]  ;;  %v754_v37 = vmul.f32 0.5, %v746_v23  ;;  %v725_v55 = vsel %vm723_vm14, %v724_v11, %v722_v35  ;;  %v715_v57 = vsel %vm714_vm1, %v1683_v9, %v713_v32  ;;  %v1333_v58 = vpop.eup %1332  ;;  %v731_v7 = vand.u32 2147483648, %v1702_v52 }
  0xe8   : > { %v445_v28 = vld [vmem:[#allocation2] sm:$0xf]  ;;  %414 = vst.msk [vmem:[#allocation3] sm:$0xf] %vm413_vm15, %v412_v27  ;;  %v772_v47 = vadd.f32 %v764_v30, %v755_v24  ;;  %v749_v61 = vadd.f32 %v725_v55, %v1649_v50  ;;  %v1335_v62 = vpop.eup %1334  ;;  %v718_v31 = vsel %vm716_vm2, %v717_v14, %v715_v57  ;;  %v734_v3 = vmul.f32 %v1333_v58, %v1700_v49 }
  0xe9   : > { %v421_v44 = vld [vmem:[#allocation2] sm:$0xf]  ;;  %447 = vrot.lane.b32.xlu1 %v445_v28, %s1466_s23  ;;  %v771_v2 = vadd.f32 %v763_v39, %v754_v37  ;;  %v770_v63 = vadd.f32 %v762_v59, %v753_v29  ;;  %v766_v50 = vmul.f32 %v1691_v45, %v725_v55  ;;  %v748_v6 = vadd.f32 %v718_v31, %v1651_v51 }
  0xea   : > { %423 = vrot.lane.b32.xlu0 %v421_v44, %s1467_s27  ;;  %v433_v41 = vld [vmem:[#allocation2] sm:$0xf]  ;;  %v757_v5 = vmul.f32 0.5, %v749_v61  ;;  %v769_v10 = vadd.f32 %v761_v60, %v752_v36  ;;  %v789_v9 = vadd.f32 %v1716_v56, %v772_v47  ;;  %v736_v11 = vsel %vm735_vm3, %v1700_v49, %v734_v3 }
  0xeb   : > { %v415_v33 = vld [vmem:[#allocation2] sm:$0xf]  ;;  %v727_v12 = vmul.f32 %v1335_v62, %v1702_v52  ;;  %v756_v14 = vmul.f32 0.5, %v748_v6  ;;  %v765_v17 = vmul.f32 %v1691_v45, %v718_v31  ;;  %v739_v8 = vsel %vm737_vm4, %v738_v25, %v736_v11 }
  0xec   : > { %v439_v15 = vld [vmem:[#allocation2] sm:$0xf]  ;;  %v774_v13 = vadd.f32 %v766_v50, %v757_v5  ;;  %v788_v4 = vadd.f32 %v1706_v53, %v771_v2  ;;  %v751_v51 = vadd.f32 %v739_v8, %v1659_v0  ;;  %v787_v18 = vadd.f32 %v779_v38, %v770_v63 }
  0xed   : > { %v427_v42 = vld [vmem:[#allocation2] sm:$0xf]  ;;  %435 = vrot.lane.b32.xlu1 %v433_v41, %s1468_s28  ;;  %v729_v56 = vsel %vm728_vm5, %v1702_v52, %v727_v12  ;;  %v773_v20 = vadd.f32 %v765_v17, %v756_v14  ;;  %v786_v49 = vadd.f32 %v1710_v54, %v769_v10  ;;  %v768_v53 = vmul.f32 %v1691_v45, %v739_v8 }
  0xee   : > { %794 = vst.msk [vmem:[#allocation2] sm:$0xf] %vm395_vm8, %v1464_v16  ;;  %417 = vrot.lane.b32.xlu0 %v415_v33, %s1469_s29  ;;  %vm730_vm8 = vcmp.eq.f32.partialorder %v1702_v52, 0.0  ;;  %v791_v19 = vadd.f32 %v783_v22, %v774_v13  ;;  %v759_v25 = vmul.f32 0.5, %v751_v51  ;;  %v785_v26 = vmul.f32 %v1689_v40, %v1659_v0  ;;  %v221_v50 = vld [vmem:[%s2023_s1] sm:$0xf] }
  0xef   : > { %v732_v21 = vsel %vm730_vm8, %v731_v7, %v729_v56  ;;  %v824_v27 = vrot.slane %v789_v9, %v1694_v46  ;;  %v790_v52 = vadd.f32 %v782_v43, %v773_v20  ;;  %v820_v28 = vrot.slane %v788_v4, %v1698_v48  ;;  %v1188_v4 = vld [vmem:[%s2023_s1 + $0x4] sm:$0xf] }
  0xf0   : > { %v750_v23 = vadd.f32 %v732_v21, %v1661_v1  ;;  %v776_v44 = vadd.f32 %v768_v53, %v759_v25  ;;  %v767_v22 = vmul.f32 %v1691_v45, %v732_v21  ;;  %v784_v54 = vmul.f32 %v1689_v40, %v1661_v1 }
  0xf1   : > { %441 = vrot.lane.b32.xlu1 %v439_v15, %s1470_s30  ;;  %v833_v29 = vrot.slane %v791_v19, %v1694_v46  ;;  %v829_v24 = vrot.slane %v790_v52, %v1698_v48  ;;  %v814_v0 = vrot.slane %v787_v18, %v1694_v46  ;;  %v809_v30 = vrot.slane %v786_v49, %v1698_v48 }
  0xf2   : > { %v758_v38 = vmul.f32 0.5, %v750_v23  ;;  %v793_v32 = vadd.f32 %v785_v26, %v776_v44  ;;  %vm815_vm6 = vcmask 154712   ;;  %v533_v56 = vstv %s1190_s10 }
  0xf3   : > { %v825_v33 = vsel %vm815_vm6, %v824_v27, %v820_v28  ;;  %v834_v36 = vsel %vm815_vm6, %v833_v29, %v829_v24  ;;  %v816_v37 = vsel %vm815_vm6, %v814_v0, %v809_v30  ;;  %v535_v19 = vstv %s1191_s12 }
  0xf4   : > { %v775_v41 = vadd.f32 %v767_v22, %v758_v38  ;;  %v842_v45 = vrot.slane %v793_v32, %v1694_v46  ;;  %v844_v1 = vsel %vm401_vm10, %v825_v33, %v816_v37  ;;  %vm1472_vm10 = vmmov 0  }
  0xf5   : > { %429 = vrot.lane.b32.xlu1 %v427_v42, %s1471_s5  ;;  %v845_v40 = vsel %vm403_vm11, %v834_v36, %v844_v1  ;;  %1242 = vmatprep.mubr.msk.f32.mxu1 %vm1472_vm10, %v1464_v16  ;;  %vm459_vm11 = vcmask 1043456   ;;  %v1473_v26 = vmov 1966171168   ;;  %v969_v28 = vstv %s1198_s14 }
  0xf6   : > { %v792_v43 = vadd.f32 %v784_v54, %v775_v41  ;;  %1231 = vmatprep.mubr.msk.f32.mxu0 %vm1472_vm10, %v1464_v16  ;;  %v545_v27 = vunpack.c.l.s4 %v1473_v26 }
  0xf8   : > { %v838_v35 = vrot.slane %v792_v43, %v1698_v48  ;;  %v546_v54 = vunpack.c.0.s8 %v545_v27 }
  0xfa   : > { %v843_v15 = vsel %vm815_vm6, %v842_v45, %v838_v35  ;;  %v549_v24 = vsub.s32 %v546_v54, %v1685_v34  ;;  %v570_v45 = vsub.s32 0, %v1685_v34 }
  0xfb   : > { %v846_v42 = vsel %vm405_vm12, %v843_v15, %v845_v40  ;;  %vm455_vm12 = vcmask 228352  }
  0xfc   : > { %848 = vst.msk [vmem:[#allocation2] sm:$0xf] %vm410_vm13, %v846_v42 }
 0x103   : > { %v881_v47 = vld [vmem:[#allocation2] sm:$0xf] }
 0x104   : > { %v869_v39 = vld [vmem:[#allocation2] sm:$0xf]  ;;  %883 = vrot.lane.b32.xlu1 %v881_v47, %s1466_s23  ;;  %s208_s23 = scalar_lea.vmem [#allocation7], %s1184_s22 }
 0x105   : > { %871 = vrot.lane.b32.xlu0 %v869_v39, %s1468_s28  ;;  %v875_v46 = vld [vmem:[#allocation2] sm:$0xf] }
 0x106   : > { %v857_v55 = vld [vmem:[#allocation2] sm:$0xf] }
 0x107   : > { %v863_v48 = vld [vmem:[#allocation2] sm:$0xf] }
 0x108   : > { %877 = vrot.lane.b32.xlu1 %v875_v46, %s1470_s30  ;;  %v851_v57 = vld [vmem:[#allocation2] sm:$0xf]  ;;  %v1874_v46 = vld [vmem:[%s1574_s11 + $0x8] sm:$0xff] }
 0x109   : > { %859 = vrot.lane.b32.xlu0 %v857_v55, %s1467_s27  ;;  %v849_v7 = vld [vmem:[#allocation2] sm:$0xf]  ;;  %s1056_s27 = sshll.u32 %s208_s23, 4  ;;  %s1925_s27 = int_to_ptr.vmem [resolvable:$true] %s1056_s27 }
 0x10a   : > { %v1870_v47 = vld [vmem:[%s1574_s11] sm:$0xff]  ;;  %s1367_s6 = scalar_lea.vmem %s1925_s27, 1024  ;;  %p1374_p13 = scmp.lt.s32.totalorder %s1925_s27, %s1372_s8 }
 0x10b   : > { %p1368_p9 = scmp.ne.s32.totalorder %s1925_s27, %s1367_s6  ;;  %p1375_p0 = scmp.lt.s32.totalorder %s1373_s9, %s1367_s6 }
 0x10c   : > { %865 = vrot.lane.b32.xlu1 %v863_v48, %s1471_s5  ;;  %v1878_v48 = vld [vmem:[%s1574_s11 + $0x10] sm:$0xff]  ;;  %s1038_s5 = scalar_lea.sflag [#allocation5], %s1902_s20 }
 0x10d   : > { %853 = vrot.lane.b32.xlu0 %v851_v57, %s1469_s29  ;;  %p1369_p10 = pnand %p1368_p9, %p1541_p5  ;;  %p1376_p1 = por %p1375_p0, %p1374_p13 }
 0x10f   : > { %p1370_p12 = pneg %p1369_p10 }
 0x111   : > { %p1377_p2 = pnand %p1376_p1, %p1370_p12 }
 0x15b   : > { %v448_v58 = vpop.permute.xlu1 %447 }
 0x15c   : > { %v424_v59 = vpop.permute.xlu0 %423  ;;  %450 = vst.msk [vmem:[#allocation3 + $0x18] sm:$0xf] %vm413_vm15, %v448_v58  ;;  %v1882_v58 = vld [vmem:[%s1574_s11 + $0x18] sm:$0xff] }
 0x15d   : > { %426 = vst.msk [vmem:[#allocation3 + $0x8] sm:$0xf] %vm413_vm15, %v424_v59 }
 0x15f   : > { %v436_v60 = vpop.permute.xlu1 %435 }
 0x160   : > { %v418_v61 = vpop.permute.xlu0 %417  ;;  %438 = vst.msk [vmem:[#allocation3 + $0x10] sm:$0xf] %vm413_vm15, %v436_v60  ;;  %v1886_v60 = vld [vmem:[%s1574_s11 + $0x20] sm:$0xff] }
 0x161   : > { %420 = vst.msk [vmem:[#allocation3 + $0x4] sm:$0xf] %vm413_vm15, %v418_v61 }
 0x163   : > { %v442_v62 = vpop.permute.xlu1 %441  ;;  %v454_v2 = vld [vmem:[#allocation3 + $0x18] sm:$0xf] }
 0x164   : > { %444 = vst.msk [vmem:[#allocation3 + $0x14] sm:$0xf] %vm413_vm15, %v442_v62  ;;  %1224 = vmatpush3.msk.msra.mxu0 %vm459_vm11, %v454_v2  ;;  %v1890_v62 = vld [vmem:[%s1574_s11 + $0x28] sm:$0xff] }
 0x165   : > { %1225 = vmatprep.subr.mxu0 %v1464_v16 }
 0x167   : > { %v430_v31 = vpop.permute.xlu1 %429 }
 0x168   : > { %v451_v3 = vld [vmem:[#allocation3] sm:$0xff]  ;;  %432 = vst.msk [vmem:[#allocation3 + $0xc] sm:$0xf] %vm413_vm15, %v430_v31  ;;  %v1894_v31 = vld [vmem:[%s1574_s11 + $0x30] sm:$0xff] }
 0x169   : > { %850 = vst.msk [vmem:[#allocation3] sm:$0xf] %vm413_vm15, %v849_v7  ;;  %v1898_v7 = vld [vmem:[%s1574_s11 + $0x38] sm:$0xff]  ;;  %s1211_s11 = sshll.u32 %s1524_s19, 10 }
 0x16a   : > { %s1923_s30 = scalar_lea.hbm %s2025_s3, %s1211_s11 }
 0x16b   : > { %v453_v63 = vld [vmem:[#allocation3 + $0x10] sm:$0xff] }
 0x16c   : > { %1226 = vmatpush3.msra.mxu0 %v453_v63 }
 0x16d   : > { %1227 = vmatprep.subr.mxu0 %v1464_v16 }
 0x16f   : > { %v452_v5 = vld [vmem:[#allocation3 + $0x8] sm:$0xff] }
 0x170   : > { %1228 = vmatpush3.msra.mxu0 %v452_v5 }
 0x171   : > { %1229 = vmatprep.subr.mxu0 %v1464_v16 }
 0x172   : > { %1230 = vmatpush3.msra.mxu0 %v451_v3 }
 0x173   : > { %1232 = vmatmul.mubr.msk.f32.vlgmr.msra.gmra.mxu0 %vm455_vm12, %v221_v50 }
 0x176   : > { %v884_v6 = vpop.permute.xlu1 %883 }
 0x177   : > { %v872_v10 = vpop.permute.xlu0 %871  ;;  %886 = vst.msk [vmem:[#allocation3 + $0x18] sm:$0xf] %vm413_vm15, %v884_v6  ;;  %v990_v6 = vsub.s32 1, %v1685_v34 }
 0x178   : > { %874 = vst.msk [vmem:[#allocation3 + $0x10] sm:$0xf] %vm413_vm15, %v872_v10 }
 0x17a   : > { %v878_v9 = vpop.permute.xlu1 %877 }
 0x17b   : > { %v860_v11 = vpop.permute.xlu0 %859  ;;  %880 = vst.msk [vmem:[#allocation3 + $0x14] sm:$0xf] %vm413_vm15, %v878_v9  ;;  %v1001_v9 = vsub.s32 2, %v1685_v34 }
 0x17c   : > { %862 = vst.msk [vmem:[#allocation3 + $0x8] sm:$0xf] %vm413_vm15, %v860_v11 }
 0x17e   : > { %v866_v12 = vpop.permute.xlu1 %865  ;;  %v890_v14 = vld [vmem:[#allocation3 + $0x18] sm:$0xf] }
 0x17f   : > { %v854_v13 = vpop.permute.xlu0 %853  ;;  %868 = vst.msk [vmem:[#allocation3 + $0xc] sm:$0xf] %vm413_vm15, %v866_v12  ;;  %1235 = vmatpush3.msk.msra.mxu1 %vm459_vm11, %v890_v14 }
 0x180   : > { %856 = vst.msk [vmem:[#allocation3 + $0x4] sm:$0xf] %vm413_vm15, %v854_v13  ;;  %1236 = vmatprep.subr.mxu1 %v1464_v16 }
 0x182   : > { %v889_v17 = vld [vmem:[#allocation3 + $0x10] sm:$0xff] }
 0x183   : > { %1237 = vmatpush3.msra.mxu1 %v889_v17 }
 0x184   : > { %1238 = vmatprep.subr.mxu1 %v1464_v16 }
 0x186   : > { %v888_v8 = vld [vmem:[#allocation3 + $0x8] sm:$0xff] }
 0x187   : > { %1239 = vmatpush3.msra.mxu1 %v888_v8  ;;  %v887_v51 = vld [vmem:[#allocation3] sm:$0xff] }
 0x188   : > { %1240 = vmatprep.subr.mxu1 %v1464_v16  ;;  %v967_v16 = vstv %s1197_s13 }
 0x189   : > { %1241 = vmatpush3.msra.mxu1 %v887_v51 }
 0x18a   : > { %1243 = vmatmul.mubr.msk.f32.vlgmr.msra.gmra.mxu1 %vm455_vm12, %v1188_v4 }
 0x233   : > { %v529_v18 = vpop.f32.mrf.mxu0 }
 0x234   : > { %v534_v20 = vmul.f32 %v533_v56, %v529_v18 }
 0x235   : > { %v1233_v21 = vpop.f32.mrf.mxu0 }
 0x236   : > { %v536_v49 = vadd.f32 %v535_v19, %v534_v20 }
 0x238   : > { %v1194_v25 = vmul.f32 -1.442695, %v536_v49 }
 0x23a   : > { %1336 = vpow2.f32 %v1194_v25 }
 0x247   : > { %v1337_v53 = vpop.eup %1336 }
 0x248   : > { %v540_v23 = vadd.f32 1.0, %v1337_v53 }
 0x24a   : > { %1338 = vrcp.f32 %v540_v23  ;;  %v963_v52 = vpop.f32.mrf.mxu1 }
 0x24b   : > { %v968_v44 = vmul.f32 %v967_v16, %v963_v52 }
 0x24c   : > { %v1244_v38 = vpop.f32.mrf.mxu1 }
 0x24d   : > { %v970_v22 = vadd.f32 %v969_v28, %v968_v44 }
 0x24f   : > { %v1201_v29 = vmul.f32 -1.442695, %v970_v22 }
 0x251   : > { %1340 = vpow2.f32 %v1201_v29 }
 0x257   : > { %v1339_v0 = vpop.eup %1338 }
 0x258   : > { %v550_v30 = vrot.slane %v1339_v0, %v549_v24 }
 0x25a   : > { %v551_v32 = vcombine.high %v550_v30, %v550_v30  ;;  %v558_v41 = vrot.slane %v550_v30, %v549_v24 }
 0x25c   : > { %v565_v33 = vrot.slane %v551_v32, %v549_v24  ;;  %v566_v43 = vcombine.high %v558_v41, %v558_v41  ;;  %v571_v37 = vrot.slane %v558_v41, %v570_v45 }
 0x25e   : > { %v567_v36 = vcombine.high %v565_v33, %v565_v33  ;;  %v575_v35 = vrot.slane %v565_v33, %v570_v45  ;;  %v1341_v1 = vpop.eup %1340  ;;  %v579_v40 = vrot.slane %v566_v43, %v570_v45  ;;  %v588_v39 = vmul.f32 %v1870_v47, %v571_v37 }
 0x25f   : > { %v974_v42 = vadd.f32 1.0, %v1341_v1  ;;  %v589_v55 = vmul.f32 %v1874_v46, %v571_v37 }
 0x260   : > { %v583_v15 = vrot.slane %v567_v36, %v570_v45  ;;  %v590_v57 = vmul.f32 %v1878_v48, %v575_v35  ;;  %v591_v59 = vmul.f32 %v1882_v58, %v575_v35  ;;  %v592_v61 = vmul.f32 %v1886_v60, %v579_v40  ;;  %596 = vst.msk [vmem:[%s208_s23] sm:$0xff] %vm240_vm0, %v588_v39 }
 0x261   : > { %1342 = vrcp.f32 %v974_v42  ;;  %v593_v2 = vmul.f32 %v1890_v62, %v579_v40  ;;  %597 = vst.msk [vmem:[%s208_s23 + $0x8] sm:$0xff] %vm240_vm0, %v589_v55 }
 0x262   : > { %v594_v3 = vmul.f32 %v1894_v31, %v583_v15  ;;  %v595_v63 = vmul.f32 %v1898_v7, %v583_v15  ;;  %598 = vst.msk [vmem:[%s208_s23 + $0x10] sm:$0xff] %vm240_vm0, %v590_v57  ;;  %599 = vst.msk [vmem:[%s208_s23 + $0x18] sm:$0xff] %vm240_vm0, %v591_v59 }
 0x263   : > { %600 = vst.msk [vmem:[%s208_s23 + $0x20] sm:$0xff] %vm240_vm0, %v592_v61  ;;  %601 = vst.msk [vmem:[%s208_s23 + $0x28] sm:$0xff] %vm240_vm0, %v593_v2 }
 0x264   : > { %602 = vst.msk [vmem:[%s208_s23 + $0x30] sm:$0xff] %vm240_vm0, %v594_v3  ;;  %603 = vst.msk [vmem:[%s208_s23 + $0x38] sm:$0xff] %vm240_vm0, %v595_v63 }
 0x26e   : > { %v1343_v5 = vpop.eup %1342 }
 0x26f   : > { %v980_v50 = vrot.slane %v1343_v5, %v570_v45  ;;  %v991_v10 = vrot.slane %v1343_v5, %v990_v6 }
 0x271   : > { %986 = vbcast.lane.b32.xlu0 %v980_v50, 264  ;;  %982 = vbcast.lane.b32.xlu1 %v980_v50, 256 }
 0x275   : > { %997 = vbcast.lane.b32.xlu0 %v991_v10, 264  ;;  %993 = vbcast.lane.b32.xlu1 %v991_v10, 256 }
 0x276   : > { %1380 = shalt.err (!%p1377_p2)
}
 0x277   : > { %s1381_s10 = scalar_lea.hbm %s1923_s30, 1024  ;;  %s1385_s14 = scalar_lea.hbm %s2025_s3, 2048 }
 0x278   : > { %p1382_p3 = scmp.ne.s32.totalorder %s1923_s30, %s1381_s10  ;;  %p1386_p8 = scmp.lt.s32.totalorder %s1923_s30, %s2025_s3 }
 0x279   : > { %p1387_p11 = scmp.lt.s32.totalorder %s1385_s14, %s1381_s10 }
 0x27a   : > { %p1383_p4 = pnand %p1382_p3, %p1541_p5 }
 0x27b   : > { %p1388_p9 = por %p1387_p11, %p1386_p8 }
 0x27c   : > { %p1384_p7 = pneg %p1383_p4 }
 0x27e   : > { %p1389_p10 = pnand %p1388_p9, %p1384_p7 }
 0x280   : > { %1392 = shalt.err (!%p1389_p10)
}
 0x281   : > { %s1475_s29 = smov 128   ;;  %s1476_s6 = smov 8   ;;  %v1002_v11 = vrot.slane %v1343_v5, %v1001_v9  ;;  %v1012_v12 = vsub.s32 3, %v1685_v34 }
 0x282   : > { %1249 = dma.vmem_to_hbm [thread:$0]  (%p1541_p5), %s1925_s27, 1024, %s1923_s30, %s1038_s5, %s1475_s29, %s1475_s29, %s1476_s6  }
 0x283   : > { %1008 = vbcast.lane.b32.xlu0 %v1002_v11, 264  ;;  %1004 = vbcast.lane.b32.xlu1 %v1002_v11, 256  ;;  %v1013_v13 = vrot.slane %v1343_v5, %v1012_v12  ;;  %s215_s7 = scalar_lea.vmem [#allocation8], %s1184_s22  ;;  %s1975_s5 = scalar_lea.hbm %s2026_s4, %s1211_s11 }
 0x284   : > { %s1072_s22 = sshll.u32 %s215_s7, 4  ;;  %s1043_s8 = scalar_lea.sflag [#allocation9], %s1902_s20  ;;  %s1977_s22 = int_to_ptr.vmem [resolvable:$true] %s1072_s22 }
 0x285   : > { %s1393_s9 = scalar_lea.vmem %s1977_s22, 1024  ;;  %s1477_s19 = smov [#allocation8]  }
 0x286   : > { %p1394_p12 = scmp.ne.s32.totalorder %s1977_s22, %s1393_s9  ;;  %s1397_s10 = sshll.u32 %s1477_s19, 4  ;;  %s1398_s10 = int_to_ptr.vmem [resolvable:$false] %s1397_s10 }
 0x287   : > { %1019 = vbcast.lane.b32.xlu0 %v1013_v13, 264  ;;  %1015 = vbcast.lane.b32.xlu1 %v1013_v13, 256  ;;  %s1399_s11 = scalar_lea.vmem %s1398_s10, 2048  ;;  %p1400_p1 = scmp.lt.s32.totalorder %s1977_s22, %s1398_s10 }
 0x288   : > { %p1395_p13 = pnand %p1394_p12, %p1541_p5  ;;  %p1401_p2 = scmp.lt.s32.totalorder %s1399_s11, %s1393_s9 }
 0x28a   : > { %p1396_p0 = pneg %p1395_p13  ;;  %p1402_p3 = por %p1401_p2, %p1400_p1 }
 0x28c   : > { %p1403_p4 = pnand %p1402_p3, %p1396_p0 }
 0x2e3   : > { %v987_v14 = vpop.permute.xlu0 %986  ;;  %v983_v17 = vpop.permute.xlu1 %982 }
 0x2e4   : > { %v1022_v8 = vmul.f32 %v1874_v46, %v987_v14  ;;  %v1021_v4 = vmul.f32 %v1870_v47, %v983_v17 }
 0x2e6   : > { %1030 = vst.msk [vmem:[%s215_s7 + $0x8] sm:$0xff] %vm240_vm0, %v1022_v8  ;;  %1029 = vst.msk [vmem:[%s215_s7] sm:$0xff] %vm240_vm0, %v1021_v4 }
 0x2e7   : > { %v998_v51 = vpop.permute.xlu0 %997  ;;  %v994_v56 = vpop.permute.xlu1 %993 }
 0x2e8   : > { %v1024_v34 = vmul.f32 %v1882_v58, %v998_v51  ;;  %v1023_v18 = vmul.f32 %v1878_v48, %v994_v56 }
 0x2ea   : > { %1032 = vst.msk [vmem:[%s215_s7 + $0x18] sm:$0xff] %vm240_vm0, %v1024_v34  ;;  %1031 = vst.msk [vmem:[%s215_s7 + $0x10] sm:$0xff] %vm240_vm0, %v1023_v18 }
 0x2f5   : > { %v1009_v19 = vpop.permute.xlu0 %1008  ;;  %v1005_v20 = vpop.permute.xlu1 %1004 }
 0x2f6   : > { %v1026_v21 = vmul.f32 %v1890_v62, %v1009_v19  ;;  %v1025_v49 = vmul.f32 %v1886_v60, %v1005_v20 }
 0x2f8   : > { %1034 = vst.msk [vmem:[%s215_s7 + $0x28] sm:$0xff] %vm240_vm0, %v1026_v21  ;;  %1033 = vst.msk [vmem:[%s215_s7 + $0x20] sm:$0xff] %vm240_vm0, %v1025_v49 }
 0x2f9   : > { %v1020_v25 = vpop.permute.xlu0 %1019  ;;  %v1016_v53 = vpop.permute.xlu1 %1015 }
 0x2fa   : > { %v1028_v23 = vmul.f32 %v1898_v7, %v1020_v25  ;;  %v1027_v16 = vmul.f32 %v1894_v31, %v1016_v53 }
 0x2fc   : > { %1036 = vst.msk [vmem:[%s215_s7 + $0x38] sm:$0xff] %vm240_vm0, %v1028_v23  ;;  %1035 = vst.msk [vmem:[%s215_s7 + $0x30] sm:$0xff] %vm240_vm0, %v1027_v16 }
 0x2fd   : > { %1406 = shalt.err (!%p1403_p4)
}
 0x2fe   : > { %s1407_s12 = scalar_lea.hbm %s1975_s5, 1024  ;;  %s1411_s14 = scalar_lea.hbm %s2026_s4, 2048 }
 0x2ff   : > { %p1408_p7 = scmp.ne.s32.totalorder %s1975_s5, %s1407_s12  ;;  %p1412_p9 = scmp.lt.s32.totalorder %s1975_s5, %s2026_s4 }
 0x300   : > { %p1413_p10 = scmp.lt.s32.totalorder %s1411_s14, %s1407_s12 }
 0x301   : > { %p1409_p8 = pnand %p1408_p7, %p1541_p5 }
 0x302   : > { %p1414_p12 = por %p1413_p10, %p1412_p9 }
 0x303   : > { %p1410_p11 = pneg %p1409_p8 }
 0x305   : > { %p1415_p13 = pnand %p1414_p12, %p1410_p11 }
 0x307   : > { %1418 = shalt.err (!%p1415_p13)
}
 0x308   : > { %1250 = dma.vmem_to_hbm [thread:$0]  (%p1541_p5), %s1977_s22, 1024, %s1975_s5, %s1043_s8, %s1475_s29, %s1475_s29, %s1476_s6  }
 0x309 PF: > { %p1266_p0 = scmp.ge.s32.totalorder %s1461_s18, 2  ;;  %s1087_s7 = sand.u32 1, %s1449_s15  }
 0x30a   : > { %s1088_s27 = scalar_lea.sflag [#allocation5], %s1087_s7 }
 0x30b   : > { %p1258_p1 = pnand %p1266_p0, %p1545_p6 }
 0x30d   : > { %p1259_p2 = pneg %p1258_p1 }
 0x30f   : > { %1440 = dma.done.wait (%p1259_p2), %s1088_s27, 1024  }
 0x310   : > { %1442 = vsyncadd (%p1259_p2), %s1088_s27, 4294966272  ;;  %s1097_s30 = scalar_lea.sflag [#allocation9], %s1087_s7 }
 0x311   : > { %1444 = dma.done.wait (%p1259_p2), %s1097_s30, 1024  }
 0x312   : > { %1446 = vsyncadd (%p1259_p2), %s1097_s30, 4294966272  ;;  %p19_p5 = scmp.ge.s32.totalorder %s1528_s21, 4   ;;  %s2030_s15 = smov %s1453_s16 }
 0x313   : > { %s2031_s16 = smov %s1457_s17  ;;  %s2032_s17 = smov %s1539_s24 }
 0x314   : > { %s2033_s18 = smov %s1528_s21  ;;  %21 = sbr.rel (!%p19_p5) target bundleno = 6 (0x6), region = 90 }
 0x319   :  { %1102 = vsyncpa [#allocation5], 1 }
 0x31a   :  { %1104 = vsyncpa [#allocation5 + $0x1], 1 }
 0x31b   :  { %1105 = vsyncpa [#allocation9], 1 }
 0x31c   :  { %1107 = vsyncpa [#allocation9 + $0x1], 1 }
 0x31d   :  { %1108 = vsyncpa [#allocation6], 1 }
 0x31e   :  { %1110 = vsyncpa [#allocation6 + $0x1], 1 }

</bundles_post_ra>
